<compile_context>
chip_gen: v5e
topology: v5e:2x2
jax: 0.10.0
libtpu: 0.0.40
codegen_flags: <defaults>
</compile_context>

<pallas_src>
import jax
import jax.numpy as jnp
import numpy as np
from jax.experimental import pallas as pl
from jax.experimental.pallas import tpu as pltpu


def _make_kernel(F, K):
    P = K // 2

    def kernel(x_ref, wup_ref, su_ref, bu_ref, wl_ref, wr_ref,
               wlow_ref, sl_ref, bl_ref, o_ref):
        NB, H, WC = x_ref.shape          # (batch tile, H, W*Cin)  -- lane dense
        WF = wup_ref.shape[1]            # W*F

        x2 = x_ref[...].reshape(NB * H, WC).astype(jnp.float32)

        # ---- upper: 1x1 conv (block-diagonal MXU matmul) + folded BN + ReLU --
        u2 = jnp.dot(x2, wup_ref[...], preferred_element_type=jnp.float32)
        u2 = jnp.maximum(u2 * su_ref[...] + bu_ref[...], 0.0)    # (NB*H, W*F)
        u3 = u2.reshape(NB, H, WF)

        wl = wl_ref[...]                 # (K, K, W*F)
        wr = wr_ref[...]

        def shift_h(a, d):
            # out[:, h, :] = a[:, h + d, :], zero outside [0, H)  (per batch el.)
            if d == 0:
                return a
            z = jnp.zeros((NB, abs(d), WF), jnp.float32)
            if d > 0:
                return jnp.concatenate([a[:, d:, :], z], axis=1)
            return jnp.concatenate([z, a[:, :d, :]], axis=1)

        def shift_w(a, s):
            # lane shift by s = dj*F: out[..., w*F+f] = a[..., (w+dj)*F+f],
            # zero fill lands exactly on the w-border because lanes are W-major.
            if s == 0:
                return a
            z = jnp.zeros((NB, H, abs(s)), jnp.float32)
            if s > 0:
                return jnp.concatenate([a[:, :, s:], z], axis=2)
            return jnp.concatenate([z, a[:, :, :s]], axis=2)

        # ---- two depthwise kxk convs (stride=1, 'same' padding) + ReLU ------
        acc_l = jnp.zeros((NB, H, WF), jnp.float32)
        acc_r = jnp.zeros((NB, H, WF), jnp.float32)
        for di in range(-P, P + 1):
            a_h = shift_h(u3, di)
            for dj in range(-P, P + 1):
                win = shift_w(a_h, dj * F)
                wl_ij = wl[di + P:di + P + 1, dj + P:dj + P + 1, :]   # (1,1,WF)
                wr_ij = wr[di + P:di + P + 1, dj + P:dj + P + 1, :]
                acc_l = acc_l + win * wl_ij
                acc_r = acc_r + win * wr_ij

        xl = jnp.maximum(acc_l, 0.0)
        xr = jnp.maximum(acc_r, 0.0)

        # ---- ReLUBabylon: exact product of the (non-negative) operands ------
        m2 = (xl * xr).reshape(NB * H, WF)

        # ---- lower: 1x1 conv (block-diagonal MXU matmul) + folded BN + ReLU --
        y2 = jnp.dot(m2, wlow_ref[...], preferred_element_type=jnp.float32)
        y2 = jnp.maximum(y2 * sl_ref[...] + bl_ref[...], 0.0)     # (NB*H, W*Cout)

        # ---- identity residual shortcut (stride=1, Cin == Cout) --------------
        out2 = y2 + x2
        o_ref[...] = out2.reshape(o_ref.shape).astype(o_ref.dtype)

    return kernel


def absrelu_block_no_norm(x, params, *, batch_block=None):
    """x: (N, H, W, Cin) float32 in NHWC."""
    N, H, W, Cin = x.shape
    w_up, su, bu = params["w_up"], params["su"], params["bu"]
    wl, wr = params["w_left"], params["w_right"]
    w_low, sl, bl = params["w_low"], params["sl"], params["bl"]
    F = w_up.shape[1]
    Cout = w_low.shape[1]
    K = wl.shape[0]
    if Cin != Cout:
        raise NotImplementedError("identity shortcut requires in_dim == out_dim")

    NB = N if batch_block is None else batch_block
    assert N % NB == 0, "batch_block must divide N"

    # Lane-dense slab: fold W into the last (lane) dimension.  Pure reshape,
    # NHWC is already contiguous in (W, C).
    x_flat = x.reshape(N, H, W * Cin)

    # Fold the 1x1 convs into block-diagonal matrices acting on the fused
    # (W*C) lane axis; tile BN scale/shift and depthwise weights over W.
    eye_w = jnp.eye(W, dtype=jnp.float32)
    w_up_big = jnp.kron(eye_w, w_up.astype(jnp.float32))       # (W*Cin, W*F)
    w_low_big = jnp.kron(eye_w, w_low.astype(jnp.float32))     # (W*F, W*Cout)
    su_big = jnp.tile(su.reshape(1, F), (1, W))                # (1, W*F)
    bu_big = jnp.tile(bu.reshape(1, F), (1, W))
    sl_big = jnp.tile(sl.reshape(1, Cout), (1, W))             # (1, W*Cout)
    bl_big = jnp.tile(bl.reshape(1, Cout), (1, W))
    wl_big = jnp.tile(wl, (1, 1, W))                           # (K, K, W*F)
    wr_big = jnp.tile(wr, (1, 1, W))

    def full_spec(a):
        nd = a.ndim

        def imap(b, _nd=nd):
            return (0,) * _nd

        return pl.BlockSpec(a.shape, imap)

    flops = (2 * N * H * (W * Cin) * (W * F)            # upper block-diag matmul
             + 2 * N * H * (W * F) * (W * Cout)         # lower block-diag matmul
             + N * H * W * F * (4 * K * K + 6)          # depthwise MACs + relu/mult
             + 2 * N * H * W * Cout)                    # BN + residual
    bytes_accessed = 4 * (x_flat.size + N * H * W * Cout
                          + w_up_big.size + w_low_big.size
                          + wl_big.size + wr_big.size
                          + su_big.size + bu_big.size + sl_big.size + bl_big.size)

    out = pl.pallas_call(
        _make_kernel(F, K),
        out_shape=jax.ShapeDtypeStruct((N, H, W * Cout), x.dtype),
        grid_spec=pltpu.PrefetchScalarGridSpec(
            num_scalar_prefetch=0,
            grid=(N // NB,),
            in_specs=[
                pl.BlockSpec((NB, H, W * Cin), lambda b: (b, 0, 0)),
                full_spec(w_up_big), full_spec(su_big), full_spec(bu_big),
                full_spec(wl_big), full_spec(wr_big),
                full_spec(w_low_big), full_spec(sl_big), full_spec(bl_big),
            ],
            out_specs=pl.BlockSpec((NB, H, W * Cout), lambda b: (b, 0, 0)),
        ),
        compiler_params=pltpu.CompilerParams(
            dimension_semantics=("parallel",)),
        cost_estimate=pl.CostEstimate(flops=int(flops), transcendentals=0,
                                      bytes_accessed=int(bytes_accessed)),
    )(x_flat, w_up_big, su_big, bu_big, wl_big, wr_big,
      w_low_big, sl_big, bl_big)

    return out.reshape(N, H, W, Cout)


def init_params(key, in_dim, out_dim, k, q):
    """Deterministic parameter init (JAX layouts):
       PyTorch upper conv (F, in, 1, 1)  -> w_up  (in, F)
       PyTorch dw conv    (F, 1, k, k)   -> w_*   (k, k, F)
       PyTorch lower conv (out, F, 1, 1) -> w_low (F, out)
       BatchNorm (eval) folded to scale/shift of shape (1, dim)."""
    F = int(q * out_dim)
    keys = jax.random.split(key, 6)
    w_up = 0.1 * jax.random.normal(keys[0], (in_dim, F), jnp.float32)
    w_left = 0.1 * jax.random.normal(keys[1], (k, k, F), jnp.float32)
    w_right = 0.1 * jax.random.normal(keys[2], (k, k, F), jnp.float32)
    w_low = 0.1 * jax.random.normal(keys[3], (F, out_dim), jnp.float32)

    eps = 1e-5

    def bn_fold(kk, dim):
        kg, kb, km, kv = jax.random.split(kk, 4)
        gamma = 1.0 + 0.1 * jax.random.normal(kg, (dim,), jnp.float32)
        beta = 0.1 * jax.random.normal(kb, (dim,), jnp.float32)
        mean = 0.1 * jax.random.normal(km, (dim,), jnp.float32)
        var = jax.random.uniform(kv, (dim,), jnp.float32, minval=0.5, maxval=1.5)
        scale = gamma / jnp.sqrt(var + eps)
        shift = beta - mean * scale
        return scale.reshape(1, dim), shift.reshape(1, dim)

    su, bu = bn_fold(keys[4], F)
    sl, bl = bn_fold(keys[5], out_dim)
    return dict(w_up=w_up, su=su, bu=bu, w_left=w_left, w_right=w_right,
                w_low=w_low, sl=sl, bl=bl)


def reference(x, p):
    """Pure-JAX reference (NHWC) for validation."""
    u = jnp.einsum('nhwc,cf->nhwf', x, p['w_up'])
    u = u * p['su'].reshape(1, 1, 1, -1) + p['bu'].reshape(1, 1, 1, -1)
    u = jnp.maximum(u, 0.0)

    def dw(a, w):
        K = w.shape[0]
        P = K // 2
        H, W = a.shape[1], a.shape[2]
        ap = jnp.pad(a, ((0, 0), (P, P), (P, P), (0, 0)))
        out = jnp.zeros_like(a)
        for i in range(K):
            for j in range(K):
                out = out + ap[:, i:i + H, j:j + W, :] * w[i, j]
        return out

    xl = jnp.maximum(dw(u, p['w_left']), 0.0)
    xr = jnp.maximum(dw(u, p['w_right']), 0.0)
    m = xl * xr
    y = jnp.einsum('nhwf,fo->nhwo', m, p['w_low'])
    y = y * p['sl'].reshape(1, 1, 1, -1) + p['bl'].reshape(1, 1, 1, -1)
    y = jnp.maximum(y, 0.0)
    return y + x


if __name__ == "__main__":
    key = jax.random.PRNGKey(0)
    kx, kp = jax.random.split(key)

    # Shapes consistent with the module: in_dim=out_dim=8, k=3, stride=1, q=2.
    N, C, H, W = 2, 8, 16, 16
    k, stride, q = 3, 1, 2

    x_nchw = jax.random.normal(kx, (N, C, H, W), jnp.float32)   # PyTorch-style input
    x = jnp.transpose(x_nchw, (0, 2, 3, 1))                     # NCHW -> NHWC

    params = init_params(kp, C, C, k, q)

    out = absrelu_block_no_norm(x, params)
    out = jax.block_until_ready(out)

    ref = reference(x, params)
    np.testing.assert_allclose(np.asarray(out), np.asarray(ref),
                               rtol=1e-4, atol=1e-4)
    print("KERNEL_OK")
</pallas_src>

<mosaic_0001>
module attributes {stable_mosaic.version = 11 : i64} {
  func.func @kernel(%arg0: i32, %arg1: memref<2x16x128xf32, #tpu.memory_space<vmem>>, %arg2: memref<128x256xf32, #tpu.memory_space<vmem>>, %arg3: memref<1x256xf32, #tpu.memory_space<vmem>>, %arg4: memref<1x256xf32, #tpu.memory_space<vmem>>, %arg5: memref<3x3x256xf32, #tpu.memory_space<vmem>>, %arg6: memref<3x3x256xf32, #tpu.memory_space<vmem>>, %arg7: memref<256x128xf32, #tpu.memory_space<vmem>>, %arg8: memref<1x128xf32, #tpu.memory_space<vmem>>, %arg9: memref<1x128xf32, #tpu.memory_space<vmem>>, %arg10: memref<2x16x128xf32, #tpu.memory_space<vmem>>) attributes {dimension_semantics = [#tpu.dimension_semantics<parallel>], iteration_bounds = array<i64: 1>, scalar_prefetch = 0 : i64, scratch_operands = 0 : i64, tpu.core_type = #tpu.core_type<tc>, window_params = [{transform_indices = @transform_0, window_bounds = array<i64: 2, 16, 128>}, {pipeline_mode = #tpu.pipeline_mode<synchronous>, transform_indices = @transform_1, window_bounds = array<i64: 128, 256>}, {pipeline_mode = #tpu.pipeline_mode<synchronous>, transform_indices = @transform_2, window_bounds = array<i64: 1, 256>}, {pipeline_mode = #tpu.pipeline_mode<synchronous>, transform_indices = @transform_3, window_bounds = array<i64: 1, 256>}, {pipeline_mode = #tpu.pipeline_mode<synchronous>, transform_indices = @transform_4, window_bounds = array<i64: 3, 3, 256>}, {pipeline_mode = #tpu.pipeline_mode<synchronous>, transform_indices = @transform_5, window_bounds = array<i64: 3, 3, 256>}, {pipeline_mode = #tpu.pipeline_mode<synchronous>, transform_indices = @transform_6, window_bounds = array<i64: 256, 128>}, {pipeline_mode = #tpu.pipeline_mode<synchronous>, transform_indices = @transform_7, window_bounds = array<i64: 1, 128>}, {pipeline_mode = #tpu.pipeline_mode<synchronous>, transform_indices = @transform_8, window_bounds = array<i64: 1, 128>}, {transform_indices = @transform_9, window_bounds = array<i64: 2, 16, 128>}]} {
    %c0 = arith.constant 0 : index
    %c0_0 = arith.constant 0 : index
    %c0_1 = arith.constant 0 : index
    %0 = vector.load %arg1[%c0, %c0_0, %c0_1] : memref<2x16x128xf32, #tpu.memory_space<vmem>>, vector<2x16x128xf32>
    %1 = vector.shape_cast %0 : vector<2x16x128xf32> to vector<32x128xf32>
    %c0_2 = arith.constant 0 : index
    %c0_3 = arith.constant 0 : index
    %2 = vector.load %arg2[%c0_2, %c0_3] : memref<128x256xf32, #tpu.memory_space<vmem>>, vector<128x256xf32>
    %cst = arith.constant dense<0.000000e+00> : vector<32x256xf32>
    %3 = tpu.matmul %1, %2, %cst {dimension_numbers = #tpu.dot_dimension_numbers<[1], [0], [0], [1], [0, 0, 1, 1], [], []>} : vector<32x128xf32>, vector<128x256xf32>, vector<32x256xf32> -> vector<32x256xf32>
    %c0_4 = arith.constant 0 : index
    %c0_5 = arith.constant 0 : index
    %4 = vector.load %arg3[%c0_4, %c0_5] : memref<1x256xf32, #tpu.memory_space<vmem>>, vector<1x256xf32>
    %5 = vector.broadcast %4 : vector<1x256xf32> to vector<32x256xf32>
    %6 = arith.mulf %3, %5 : vector<32x256xf32>
    %c0_6 = arith.constant 0 : index
    %c0_7 = arith.constant 0 : index
    %7 = vector.load %arg4[%c0_6, %c0_7] : memref<1x256xf32, #tpu.memory_space<vmem>>, vector<1x256xf32>
    %8 = vector.broadcast %7 : vector<1x256xf32> to vector<32x256xf32>
    %9 = arith.addf %6, %8 : vector<32x256xf32>
    %cst_8 = arith.constant 0.000000e+00 : f32
    %10 = vector.broadcast %cst_8 : f32 to vector<32x256xf32>
    %11 = arith.maximumf %9, %10 : vector<32x256xf32>
    %12 = vector.shape_cast %11 : vector<32x256xf32> to vector<2x16x256xf32>
    %c0_9 = arith.constant 0 : index
    %c0_10 = arith.constant 0 : index
    %c0_11 = arith.constant 0 : index
    %13 = vector.load %arg5[%c0_9, %c0_10, %c0_11] : memref<3x3x256xf32, #tpu.memory_space<vmem>>, vector<3x3x256xf32>
    %c0_12 = arith.constant 0 : index
    %c0_13 = arith.constant 0 : index
    %c0_14 = arith.constant 0 : index
    %14 = vector.load %arg6[%c0_12, %c0_13, %c0_14] : memref<3x3x256xf32, #tpu.memory_space<vmem>>, vector<3x3x256xf32>
    %cst_15 = arith.constant 0.000000e+00 : f32
    %15 = vector.broadcast %cst_15 : f32 to vector<2x16x256xf32>
    %cst_16 = arith.constant 0.000000e+00 : f32
    %16 = vector.broadcast %cst_16 : f32 to vector<2x16x256xf32>
    %cst_17 = arith.constant 0.000000e+00 : f32
    %17 = vector.broadcast %cst_17 : f32 to vector<2x1x256xf32>
    %18 = vector.extract_strided_slice %12 {offsets = [0, 0, 0], sizes = [2, 15, 256], strides = [1, 1, 1]} : vector<2x16x256xf32> to vector<2x15x256xf32>
    %19 = tpu.concatenate %17, %18 in 1 : vector<2x1x256xf32>, vector<2x15x256xf32> -> vector<2x16x256xf32>
    %cst_18 = arith.constant 0.000000e+00 : f32
    %20 = vector.broadcast %cst_18 : f32 to vector<2x16x16xf32>
    %21 = vector.extract_strided_slice %19 {offsets = [0, 0, 0], sizes = [2, 16, 240], strides = [1, 1, 1]} : vector<2x16x256xf32> to vector<2x16x240xf32>
    %22 = tpu.concatenate %20, %21 in 2 : vector<2x16x16xf32>, vector<2x16x240xf32> -> vector<2x16x256xf32>
    %23 = vector.extract_strided_slice %13 {offsets = [0, 0, 0], sizes = [1, 1, 256], strides = [1, 1, 1]} : vector<3x3x256xf32> to vector<1x1x256xf32>
    %24 = vector.extract_strided_slice %14 {offsets = [0, 0, 0], sizes = [1, 1, 256], strides = [1, 1, 1]} : vector<3x3x256xf32> to vector<1x1x256xf32>
    %25 = vector.broadcast %23 : vector<1x1x256xf32> to vector<2x16x256xf32>
    %26 = arith.mulf %22, %25 : vector<2x16x256xf32>
    %27 = arith.addf %15, %26 : vector<2x16x256xf32>
    %28 = vector.broadcast %24 : vector<1x1x256xf32> to vector<2x16x256xf32>
    %29 = arith.mulf %22, %28 : vector<2x16x256xf32>
    %30 = arith.addf %16, %29 : vector<2x16x256xf32>
    %31 = vector.extract_strided_slice %13 {offsets = [0, 1, 0], sizes = [1, 1, 256], strides = [1, 1, 1]} : vector<3x3x256xf32> to vector<1x1x256xf32>
    %32 = vector.extract_strided_slice %14 {offsets = [0, 1, 0], sizes = [1, 1, 256], strides = [1, 1, 1]} : vector<3x3x256xf32> to vector<1x1x256xf32>
    %33 = vector.broadcast %31 : vector<1x1x256xf32> to vector<2x16x256xf32>
    %34 = arith.mulf %19, %33 : vector<2x16x256xf32>
    %35 = arith.addf %27, %34 : vector<2x16x256xf32>
    %36 = vector.broadcast %32 : vector<1x1x256xf32> to vector<2x16x256xf32>
    %37 = arith.mulf %19, %36 : vector<2x16x256xf32>
    %38 = arith.addf %30, %37 : vector<2x16x256xf32>
    %cst_19 = arith.constant 0.000000e+00 : f32
    %39 = vector.broadcast %cst_19 : f32 to vector<2x16x16xf32>
    %40 = vector.extract_strided_slice %19 {offsets = [0, 0, 16], sizes = [2, 16, 240], strides = [1, 1, 1]} : vector<2x16x256xf32> to vector<2x16x240xf32>
    %41 = tpu.concatenate %40, %39 in 2 : vector<2x16x240xf32>, vector<2x16x16xf32> -> vector<2x16x256xf32>
    %42 = vector.extract_strided_slice %13 {offsets = [0, 2, 0], sizes = [1, 1, 256], strides = [1, 1, 1]} : vector<3x3x256xf32> to vector<1x1x256xf32>
    %43 = vector.extract_strided_slice %14 {offsets = [0, 2, 0], sizes = [1, 1, 256], strides = [1, 1, 1]} : vector<3x3x256xf32> to vector<1x1x256xf32>
    %44 = vector.broadcast %42 : vector<1x1x256xf32> to vector<2x16x256xf32>
    %45 = arith.mulf %41, %44 : vector<2x16x256xf32>
    %46 = arith.addf %35, %45 : vector<2x16x256xf32>
    %47 = vector.broadcast %43 : vector<1x1x256xf32> to vector<2x16x256xf32>
    %48 = arith.mulf %41, %47 : vector<2x16x256xf32>
    %49 = arith.addf %38, %48 : vector<2x16x256xf32>
    %cst_20 = arith.constant 0.000000e+00 : f32
    %50 = vector.broadcast %cst_20 : f32 to vector<2x16x16xf32>
    %51 = vector.extract_strided_slice %12 {offsets = [0, 0, 0], sizes = [2, 16, 240], strides = [1, 1, 1]} : vector<2x16x256xf32> to vector<2x16x240xf32>
    %52 = tpu.concatenate %50, %51 in 2 : vector<2x16x16xf32>, vector<2x16x240xf32> -> vector<2x16x256xf32>
    %53 = vector.extract_strided_slice %13 {offsets = [1, 0, 0], sizes = [1, 1, 256], strides = [1, 1, 1]} : vector<3x3x256xf32> to vector<1x1x256xf32>
    %54 = vector.extract_strided_slice %14 {offsets = [1, 0, 0], sizes = [1, 1, 256], strides = [1, 1, 1]} : vector<3x3x256xf32> to vector<1x1x256xf32>
    %55 = vector.broadcast %53 : vector<1x1x256xf32> to vector<2x16x256xf32>
    %56 = arith.mulf %52, %55 : vector<2x16x256xf32>
    %57 = arith.addf %46, %56 : vector<2x16x256xf32>
    %58 = vector.broadcast %54 : vector<1x1x256xf32> to vector<2x16x256xf32>
    %59 = arith.mulf %52, %58 : vector<2x16x256xf32>
    %60 = arith.addf %49, %59 : vector<2x16x256xf32>
    %61 = vector.extract_strided_slice %13 {offsets = [1, 1, 0], sizes = [1, 1, 256], strides = [1, 1, 1]} : vector<3x3x256xf32> to vector<1x1x256xf32>
    %62 = vector.extract_strided_slice %14 {offsets = [1, 1, 0], sizes = [1, 1, 256], strides = [1, 1, 1]} : vector<3x3x256xf32> to vector<1x1x256xf32>
    %63 = vector.broadcast %61 : vector<1x1x256xf32> to vector<2x16x256xf32>
    %64 = arith.mulf %12, %63 : vector<2x16x256xf32>
    %65 = arith.addf %57, %64 : vector<2x16x256xf32>
    %66 = vector.broadcast %62 : vector<1x1x256xf32> to vector<2x16x256xf32>
    %67 = arith.mulf %12, %66 : vector<2x16x256xf32>
    %68 = arith.addf %60, %67 : vector<2x16x256xf32>
    %cst_21 = arith.constant 0.000000e+00 : f32
    %69 = vector.broadcast %cst_21 : f32 to vector<2x16x16xf32>
    %70 = vector.extract_strided_slice %12 {offsets = [0, 0, 16], sizes = [2, 16, 240], strides = [1, 1, 1]} : vector<2x16x256xf32> to vector<2x16x240xf32>
    %71 = tpu.concatenate %70, %69 in 2 : vector<2x16x240xf32>, vector<2x16x16xf32> -> vector<2x16x256xf32>
    %72 = vector.extract_strided_slice %13 {offsets = [1, 2, 0], sizes = [1, 1, 256], strides = [1, 1, 1]} : vector<3x3x256xf32> to vector<1x1x256xf32>
    %73 = vector.extract_strided_slice %14 {offsets = [1, 2, 0], sizes = [1, 1, 256], strides = [1, 1, 1]} : vector<3x3x256xf32> to vector<1x1x256xf32>
    %74 = vector.broadcast %72 : vector<1x1x256xf32> to vector<2x16x256xf32>
    %75 = arith.mulf %71, %74 : vector<2x16x256xf32>
    %76 = arith.addf %65, %75 : vector<2x16x256xf32>
    %77 = vector.broadcast %73 : vector<1x1x256xf32> to vector<2x16x256xf32>
    %78 = arith.mulf %71, %77 : vector<2x16x256xf32>
    %79 = arith.addf %68, %78 : vector<2x16x256xf32>
    %cst_22 = arith.constant 0.000000e+00 : f32
    %80 = vector.broadcast %cst_22 : f32 to vector<2x1x256xf32>
    %81 = vector.extract_strided_slice %12 {offsets = [0, 1, 0], sizes = [2, 15, 256], strides = [1, 1, 1]} : vector<2x16x256xf32> to vector<2x15x256xf32>
    %82 = tpu.concatenate %81, %80 in 1 : vector<2x15x256xf32>, vector<2x1x256xf32> -> vector<2x16x256xf32>
    %cst_23 = arith.constant 0.000000e+00 : f32
    %83 = vector.broadcast %cst_23 : f32 to vector<2x16x16xf32>
    %84 = vector.extract_strided_slice %82 {offsets = [0, 0, 0], sizes = [2, 16, 240], strides = [1, 1, 1]} : vector<2x16x256xf32> to vector<2x16x240xf32>
    %85 = tpu.concatenate %83, %84 in 2 : vector<2x16x16xf32>, vector<2x16x240xf32> -> vector<2x16x256xf32>
    %86 = vector.extract_strided_slice %13 {offsets = [2, 0, 0], sizes = [1, 1, 256], strides = [1, 1, 1]} : vector<3x3x256xf32> to vector<1x1x256xf32>
    %87 = vector.extract_strided_slice %14 {offsets = [2, 0, 0], sizes = [1, 1, 256], strides = [1, 1, 1]} : vector<3x3x256xf32> to vector<1x1x256xf32>
    %88 = vector.broadcast %86 : vector<1x1x256xf32> to vector<2x16x256xf32>
    %89 = arith.mulf %85, %88 : vector<2x16x256xf32>
    %90 = arith.addf %76, %89 : vector<2x16x256xf32>
    %91 = vector.broadcast %87 : vector<1x1x256xf32> to vector<2x16x256xf32>
    %92 = arith.mulf %85, %91 : vector<2x16x256xf32>
    %93 = arith.addf %79, %92 : vector<2x16x256xf32>
    %94 = vector.extract_strided_slice %13 {offsets = [2, 1, 0], sizes = [1, 1, 256], strides = [1, 1, 1]} : vector<3x3x256xf32> to vector<1x1x256xf32>
    %95 = vector.extract_strided_slice %14 {offsets = [2, 1, 0], sizes = [1, 1, 256], strides = [1, 1, 1]} : vector<3x3x256xf32> to vector<1x1x256xf32>
    %96 = vector.broadcast %94 : vector<1x1x256xf32> to vector<2x16x256xf32>
    %97 = arith.mulf %82, %96 : vector<2x16x256xf32>
    %98 = arith.addf %90, %97 : vector<2x16x256xf32>
    %99 = vector.broadcast %95 : vector<1x1x256xf32> to vector<2x16x256xf32>
    %100 = arith.mulf %82, %99 : vector<2x16x256xf32>
    %101 = arith.addf %93, %100 : vector<2x16x256xf32>
    %cst_24 = arith.constant 0.000000e+00 : f32
    %102 = vector.broadcast %cst_24 : f32 to vector<2x16x16xf32>
    %103 = vector.extract_strided_slice %82 {offsets = [0, 0, 16], sizes = [2, 16, 240], strides = [1, 1, 1]} : vector<2x16x256xf32> to vector<2x16x240xf32>
    %104 = tpu.concatenate %103, %102 in 2 : vector<2x16x240xf32>, vector<2x16x16xf32> -> vector<2x16x256xf32>
    %105 = vector.extract_strided_slice %13 {offsets = [2, 2, 0], sizes = [1, 1, 256], strides = [1, 1, 1]} : vector<3x3x256xf32> to vector<1x1x256xf32>
    %106 = vector.extract_strided_slice %14 {offsets = [2, 2, 0], sizes = [1, 1, 256], strides = [1, 1, 1]} : vector<3x3x256xf32> to vector<1x1x256xf32>
    %107 = vector.broadcast %105 : vector<1x1x256xf32> to vector<2x16x256xf32>
    %108 = arith.mulf %104, %107 : vector<2x16x256xf32>
    %109 = arith.addf %98, %108 : vector<2x16x256xf32>
    %110 = vector.broadcast %106 : vector<1x1x256xf32> to vector<2x16x256xf32>
    %111 = arith.mulf %104, %110 : vector<2x16x256xf32>
    %112 = arith.addf %101, %111 : vector<2x16x256xf32>
    %cst_25 = arith.constant 0.000000e+00 : f32
    %113 = vector.broadcast %cst_25 : f32 to vector<2x16x256xf32>
    %114 = arith.maximumf %109, %113 : vector<2x16x256xf32>
    %cst_26 = arith.constant 0.000000e+00 : f32
    %115 = vector.broadcast %cst_26 : f32 to vector<2x16x256xf32>
    %116 = arith.maximumf %112, %115 : vector<2x16x256xf32>
    %117 = arith.mulf %114, %116 : vector<2x16x256xf32>
    %118 = vector.shape_cast %117 : vector<2x16x256xf32> to vector<32x256xf32>
    %c0_27 = arith.constant 0 : index
    %c0_28 = arith.constant 0 : index
    %119 = vector.load %arg7[%c0_27, %c0_28] : memref<256x128xf32, #tpu.memory_space<vmem>>, vector<256x128xf32>
    %cst_29 = arith.constant dense<0.000000e+00> : vector<32x128xf32>
    %120 = tpu.matmul %118, %119, %cst_29 {dimension_numbers = #tpu.dot_dimension_numbers<[1], [0], [0], [1], [0, 0, 1, 1], [], []>} : vector<32x256xf32>, vector<256x128xf32>, vector<32x128xf32> -> vector<32x128xf32>
    %c0_30 = arith.constant 0 : index
    %c0_31 = arith.constant 0 : index
    %121 = vector.load %arg8[%c0_30, %c0_31] : memref<1x128xf32, #tpu.memory_space<vmem>>, vector<1x128xf32>
    %122 = vector.broadcast %121 : vector<1x128xf32> to vector<32x128xf32>
    %123 = arith.mulf %120, %122 : vector<32x128xf32>
    %c0_32 = arith.constant 0 : index
    %c0_33 = arith.constant 0 : index
    %124 = vector.load %arg9[%c0_32, %c0_33] : memref<1x128xf32, #tpu.memory_space<vmem>>, vector<1x128xf32>
    %125 = vector.broadcast %124 : vector<1x128xf32> to vector<32x128xf32>
    %126 = arith.addf %123, %125 : vector<32x128xf32>
    %cst_34 = arith.constant 0.000000e+00 : f32
    %127 = vector.broadcast %cst_34 : f32 to vector<32x128xf32>
    %128 = arith.maximumf %126, %127 : vector<32x128xf32>
    %129 = arith.addf %128, %1 : vector<32x128xf32>
    %130 = vector.shape_cast %129 : vector<32x128xf32> to vector<2x16x128xf32>
    %c0_35 = arith.constant 0 : index
    %c0_36 = arith.constant 0 : index
    %c0_37 = arith.constant 0 : index
    %131 = vector.load %arg10[%c0_35, %c0_36, %c0_37] : memref<2x16x128xf32, #tpu.memory_space<vmem>>, vector<2x16x128xf32>
    tpu.vector_store %arg10[%c0_35, %c0_36, %c0_37], %130 {strides = array<i32>} : memref<2x16x128xf32, #tpu.memory_space<vmem>>, vector<2x16x128xf32>,
    return
  }
  func.func @transform_0(%arg0: i32) -> (i32, i32, i32) {
    %c0_i32 = arith.constant 0 : i32
    %c0_i32_0 = arith.constant 0 : i32
    %c0_i32_1 = arith.constant 0 : i32
    return %arg0, %c0_i32, %c0_i32_0 : i32, i32, i32
  }
  func.func @transform_1(%arg0: i32) -> (i32, i32) {
    %c0_i32 = arith.constant 0 : i32
    %c0_i32_0 = arith.constant 0 : i32
    %c0_i32_1 = arith.constant 0 : i32
    return %c0_i32, %c0_i32_0 : i32, i32
  }
  func.func @transform_2(%arg0: i32) -> (i32, i32) {
    %c0_i32 = arith.constant 0 : i32
    %c0_i32_0 = arith.constant 0 : i32
    %c0_i32_1 = arith.constant 0 : i32
    return %c0_i32, %c0_i32_0 : i32, i32
  }
  func.func @transform_3(%arg0: i32) -> (i32, i32) {
    %c0_i32 = arith.constant 0 : i32
    %c0_i32_0 = arith.constant 0 : i32
    %c0_i32_1 = arith.constant 0 : i32
    return %c0_i32, %c0_i32_0 : i32, i32
  }
  func.func @transform_4(%arg0: i32) -> (i32, i32, i32) {
    %c0_i32 = arith.constant 0 : i32
    %c0_i32_0 = arith.constant 0 : i32
    %c0_i32_1 = arith.constant 0 : i32
    %c0_i32_2 = arith.constant 0 : i32
    return %c0_i32, %c0_i32_0, %c0_i32_1 : i32, i32, i32
  }
  func.func @transform_5(%arg0: i32) -> (i32, i32, i32) {
    %c0_i32 = arith.constant 0 : i32
    %c0_i32_0 = arith.constant 0 : i32
    %c0_i32_1 = arith.constant 0 : i32
    %c0_i32_2 = arith.constant 0 : i32
    return %c0_i32, %c0_i32_0, %c0_i32_1 : i32, i32, i32
  }
  func.func @transform_6(%arg0: i32) -> (i32, i32) {
    %c0_i32 = arith.constant 0 : i32
    %c0_i32_0 = arith.constant 0 : i32
    %c0_i32_1 = arith.constant 0 : i32
    return %c0_i32, %c0_i32_0 : i32, i32
  }
  func.func @transform_7(%arg0: i32) -> (i32, i32) {
    %c0_i32 = arith.constant 0 : i32
    %c0_i32_0 = arith.constant 0 : i32
    %c0_i32_1 = arith.constant 0 : i32
    return %c0_i32, %c0_i32_0 : i32, i32
  }
  func.func @transform_8(%arg0: i32) -> (i32, i32) {
    %c0_i32 = arith.constant 0 : i32
    %c0_i32_0 = arith.constant 0 : i32
    %c0_i32_1 = arith.constant 0 : i32
    return %c0_i32, %c0_i32_0 : i32, i32
  }
  func.func @transform_9(%arg0: i32) -> (i32, i32, i32) {
    %c0_i32 = arith.constant 0 : i32
    %c0_i32_0 = arith.constant 0 : i32
    %c0_i32_1 = arith.constant 0 : i32
    return %arg0, %c0_i32, %c0_i32_0 : i32, i32, i32
  }
}

</mosaic_0001>

<bundles_post_ra>
// kernel: tpu_custom_call.1
= control target key start
LH: loop header
LB: loop body
LE: loop exit
PB: predicated region body
PF: predicated region fallthrough
CT: control target
= control target key end

     0   :  { %14 = vsyncpa [#allocation3], 0  ;;  %s2095_s0 = inlined_call_operand.hbm [shape: f32[2,16,128], index: 0, kind: input, shape index: {}]   ;;  %s2096_s1 = inlined_call_operand.hbm [shape: f32[128,256], index: 1, kind: input, shape index: {}]   ;;  %s2097_s2 = inlined_call_operand.hbm [shape: f32[1,256], index: 2, kind: input, shape index: {}]   ;;  %s2098_s3 = inlined_call_operand.vmem [shape: f32[1,256], index: 3, kind: input, shape index: {}]   ;;  %s2099_s4 = inlined_call_operand.hbm [shape: f32[3,3,256], index: 4, kind: input, shape index: {}]   ;;  %s2100_s5 = inlined_call_operand.hbm [shape: f32[3,3,256], index: 5, kind: input, shape index: {}]   ;;  %s2101_s6 = inlined_call_operand.hbm [shape: f32[256,128], index: 6, kind: input, shape index: {}]   ;;  %s2102_s7 = inlined_call_operand.vmem [shape: f32[1,128], index: 7, kind: input, shape index: {}]   ;;  %s2103_s8 = inlined_call_operand.vmem [shape: f32[1,128], index: 8, kind: input, shape index: {}]   ;;  %s2104_s9 = inlined_call_operand.hbm [shape: f32[2,16,128], index: 9, kind: output, shape index: {}]  }
   0x1   :  { %15 = vsyncpa [#allocation6], 0 }
   0x2   :  { %16 = vsyncpa [#allocation9], 0 }
   0x3   :  { %17 = vsyncpa [#allocation12], 0  ;;  %s36_s11 = sshll.u32 %s2096_s1, 4  ;;  %s37_s11 = int_to_ptr.hbm [resolvable:$true] %s36_s11 }
   0x4   :  { %18 = vsyncpa [#allocation4], 0  ;;  %s1283_s12 = smov [#allocation5]   ;;  %s1284_s14 = smov 256  }
   0x5   :  { %s38_s13 = sshll.u32 %s1283_s12, 4  ;;  %s1285_s15 = smov 16   ;;  %s39_s13 = int_to_ptr.vmem [resolvable:$true] %s38_s13 }
   0x6   :  { %44 = dma.hbm_to_vmem [thread:$0]  %s37_s11, 4096, %s39_s13, [#allocation6], %s1284_s14, %s1284_s14, %s1285_s15  }
   0x7   :  { %s62_s18 = sshll.u32 %s2099_s4, 4  ;;  %s1286_s19 = smov [#allocation8]   ;;  %s63_s18 = int_to_ptr.hbm [resolvable:$true] %s62_s18 }
   0x8   :  { %s64_s20 = sshll.u32 %s1286_s19, 4  ;;  %s23_s1 = sshll.u32 %s2095_s0, 4  ;;  %s65_s20 = int_to_ptr.vmem [resolvable:$true] %s64_s20  ;;  %s24_s1 = int_to_ptr.hbm [resolvable:$true] %s23_s1 }
   0x9   :  { %s1287_s23 = smov 128   ;;  %s1288_s24 = smov 8  }
   0xa   :  { %70 = dma.hbm_to_vmem [thread:$0]  %s63_s18, 384, %s65_s20, [#allocation9], %s1287_s23, %s1287_s23, %s1288_s24  }
   0xb   :  { %s50_s27 = sshll.u32 %s2097_s2, 4  ;;  %s1289_s4 = smov [#allocation2]   ;;  %s51_s27 = int_to_ptr.hbm [resolvable:$true] %s50_s27 }
   0xc   :  { %s25_s28 = sshll.u32 %s1289_s4, 4  ;;  %s1290_s0 = smov [#allocation7]   ;;  %s26_s28 = int_to_ptr.vmem [resolvable:$true] %s25_s28 }
   0xd   :  { %31 = dma.hbm_to_vmem [thread:$0]  %s24_s1, 512, %s26_s28, [#allocation3], %s1287_s23, %s1287_s23, %s1288_s24  }
   0xe   :  { %s52_s29 = sshll.u32 %s1290_s0, 4  ;;  %s75_s11 = sshll.u32 %s2100_s5, 4  ;;  %s53_s29 = int_to_ptr.vmem [resolvable:$true] %s52_s29  ;;  %s76_s11 = int_to_ptr.hbm [resolvable:$true] %s75_s11 }
   0xf   :  { %55 = dma.hbm_to_vmem [thread:$0]  %s51_s27, 32, %s53_s29, [#allocation6]  }
  0x10   :  { %s88_s2 = sshll.u32 %s2101_s6, 4  ;;  %s1291_s14 = smov [#allocation10]   ;;  %s89_s2 = int_to_ptr.hbm [resolvable:$true] %s88_s2 }
  0x11   :  { %s77_s16 = sshll.u32 %s1291_s14, 4  ;;  %s1292_s17 = smov [#allocation11]   ;;  %s78_s16 = int_to_ptr.vmem [resolvable:$true] %s77_s16 }
  0x12   :  { %83 = dma.hbm_to_vmem [thread:$0]  %s76_s11, 384, %s78_s16, [#allocation9], %s1287_s23, %s1287_s23, %s1288_s24  }
  0x13   :  { %s90_s18 = sshll.u32 %s1292_s17, 4  ;;  %s91_s18 = int_to_ptr.vmem [resolvable:$true] %s90_s18 }
  0x14   :  { %96 = dma.hbm_to_vmem [thread:$0]  %s89_s2, 4096, %s91_s18, [#allocation12], %s1287_s23, %s1287_s23, %s1288_s24  }
  0x15   :  { %1273 = dma.done.wait [#allocation3], 512  }
  0x16   :  { %1274 = vsyncadd [#allocation3], 4294966784 }
  0x17   :  { %1275 = dma.done.wait [#allocation6], 4128  }
  0x18   :  { %1276 = vsyncadd [#allocation6], 4294963168 }
  0x19   :  { %1277 = dma.done.wait [#allocation9], 768  }
  0x1a   :  { %1278 = vsyncadd [#allocation9], 4294966528 }
  0x1b   :  { %1279 = dma.done.wait [#allocation12], 4096  }
  0x1c   :  { %1280 = vsyncadd [#allocation12], 4294963200  ;;  %v159_v0 = vld [vmem:[#allocation5 + $0xf0] sm:$0xff]  ;;  %v160_v1 = vld [vmem:[#allocation5 + $0xf8] sm:$0xff]  ;;  %vm269_vm0 = vcmask 1040384   ;;  %vm696_vm1 = vcmask 1046528  }
  0x1d   :  { %v157_v2 = vld [vmem:[#allocation5 + $0xe0] sm:$0xff]  ;;  %161 = vmatpush.msra.mxu0 %v159_v0  ;;  %190 = vmatpush.msra.mxu1 %v160_v1  ;;  %v158_v3 = vld [vmem:[#allocation5 + $0xe8] sm:$0xff]  ;;  %v155_v4 = vld [vmem:[#allocation5 + $0xd0] sm:$0xff]  ;;  %vm314_vm2 = vcmask 130048   ;;  %vm437_vm3 = vcmask 916480   ;;  %s1071_s25 = sshll.u32 %s2104_s9, 4  ;;  %s1072_s25 = int_to_ptr.hbm [resolvable:$true] %s1071_s25 }
  0x1e   :  { %v156_v5 = vld [vmem:[#allocation5 + $0xd8] sm:$0xff]  ;;  %v153_v6 = vld [vmem:[#allocation5 + $0xc0] sm:$0xff]  ;;  %v154_v7 = vld [vmem:[#allocation5 + $0xc8] sm:$0xff] }
  0x1f   :  { %162 = vmatpush.msra.mxu0 %v157_v2  ;;  %191 = vmatpush.msra.mxu1 %v158_v3  ;;  %v151_v8 = vld [vmem:[#allocation5 + $0xb0] sm:$0xff]  ;;  %v152_v9 = vld [vmem:[#allocation5 + $0xb8] sm:$0xff]  ;;  %v149_v10 = vld [vmem:[#allocation5 + $0xa0] sm:$0xff] }
  0x20   :  { %v150_v11 = vld [vmem:[#allocation5 + $0xa8] sm:$0xff]  ;;  %v147_v12 = vld [vmem:[#allocation5 + $0x90] sm:$0xff]  ;;  %v148_v13 = vld [vmem:[#allocation5 + $0x98] sm:$0xff] }
  0x21   :  { %163 = vmatpush.msra.mxu0 %v155_v4  ;;  %192 = vmatpush.msra.mxu1 %v156_v5  ;;  %v145_v14 = vld [vmem:[#allocation5 + $0x80] sm:$0xff]  ;;  %v146_v15 = vld [vmem:[#allocation5 + $0x88] sm:$0xff]  ;;  %v143_v16 = vld [vmem:[#allocation5 + $0x70] sm:$0xff] }
  0x22   :  { %v144_v17 = vld [vmem:[#allocation5 + $0x78] sm:$0xff]  ;;  %v141_v18 = vld [vmem:[#allocation5 + $0x60] sm:$0xff]  ;;  %v142_v19 = vld [vmem:[#allocation5 + $0x68] sm:$0xff] }
  0x23   :  { %164 = vmatpush.msra.mxu0 %v153_v6  ;;  %193 = vmatpush.msra.mxu1 %v154_v7  ;;  %v139_v20 = vld [vmem:[#allocation5 + $0x50] sm:$0xff]  ;;  %v140_v21 = vld [vmem:[#allocation5 + $0x58] sm:$0xff]  ;;  %v137_v22 = vld [vmem:[#allocation5 + $0x40] sm:$0xff] }
  0x24   :  { %v138_v23 = vld [vmem:[#allocation5 + $0x48] sm:$0xff]  ;;  %v135_v24 = vld [vmem:[#allocation5 + $0x30] sm:$0xff]  ;;  %v136_v25 = vld [vmem:[#allocation5 + $0x38] sm:$0xff] }
  0x25   :  { %165 = vmatpush.msra.mxu0 %v151_v8  ;;  %194 = vmatpush.msra.mxu1 %v152_v9  ;;  %v133_v26 = vld [vmem:[#allocation5 + $0x20] sm:$0xff]  ;;  %v134_v27 = vld [vmem:[#allocation5 + $0x28] sm:$0xff]  ;;  %v131_v28 = vld [vmem:[#allocation5 + $0x10] sm:$0xff] }
  0x26   :  { %v132_v29 = vld [vmem:[#allocation5 + $0x18] sm:$0xff]  ;;  %v129_v30 = vld [vmem:[#allocation5] sm:$0xff]  ;;  %v130_v31 = vld [vmem:[#allocation5 + $0x8] sm:$0xff] }
  0x27   :  { %166 = vmatpush.msra.mxu0 %v149_v10  ;;  %195 = vmatpush.msra.mxu1 %v150_v11  ;;  %v125_v32 = vld [vmem:[#allocation2] sm:$0xff]  ;;  %v126_v33 = vld [vmem:[#allocation2 + $0x8] sm:$0xff]  ;;  %v127_v34 = vld [vmem:[#allocation2 + $0x10] sm:$0xff] }
  0x28   :  { %v128_v35 = vld [vmem:[#allocation2 + $0x18] sm:$0xff]  ;;  %v219_v36 = vld [vmem:[#allocation7] sm:$0x3] }
  0x29   :  { %167 = vmatpush.msra.mxu0 %v147_v12  ;;  %196 = vmatpush.msra.mxu1 %v148_v13  ;;  %v233_v37 = vld [vmem:[%s2098_s3] sm:$0x3]  ;;  %v1379_v38 = vperm.slane %v219_v36, 0  ;;  %v222_v39 = vperm.slane %v219_v36, 1  ;;  %s1293_s3 = smov 112  }
  0x2a   :  { %v1381_v40 = vperm.slane %v233_v37, 0  ;;  %v236_v41 = vperm.slane %v233_v37, 1  ;;  %v1439_v12 = vld [vmem:[#allocation8] sm:$0x77]  ;;  %v1441_v13 = vld [vmem:[#allocation10] sm:$0x77] }
  0x2b   :  { %168 = vmatpush.msra.mxu0 %v145_v14  ;;  %197 = vmatpush.msra.mxu1 %v146_v15 }
  0x2d   :  { %169 = vmatpush.msra.mxu0 %v143_v16  ;;  %198 = vmatpush.msra.mxu1 %v144_v17  ;;  %v378_v17 = vperm.slane %v1439_v12, 5 }
  0x2f   :  { %170 = vmatpush.msra.mxu0 %v141_v18  ;;  %199 = vmatpush.msra.mxu1 %v142_v19  ;;  %v400_v18 = vperm.slane %v1441_v13, 5 }
  0x31   :  { %171 = vmatpush.msra.mxu0 %v139_v20  ;;  %200 = vmatpush.msra.mxu1 %v140_v21 }
  0x33   :  { %172 = vmatpush.msra.mxu0 %v137_v22  ;;  %201 = vmatpush.msra.mxu1 %v138_v23 }
  0x35   :  { %173 = vmatpush.msra.mxu0 %v135_v24  ;;  %202 = vmatpush.msra.mxu1 %v136_v25 }
  0x37   :  { %174 = vmatpush.msra.mxu0 %v133_v26  ;;  %203 = vmatpush.msra.mxu1 %v134_v27 }
  0x39   :  { %175 = vmatpush.msra.mxu0 %v131_v28  ;;  %204 = vmatpush.msra.mxu1 %v132_v29 }
  0x3b   :  { %176 = vmatpush.msra.mxu0 %v129_v30  ;;  %205 = vmatpush.msra.mxu1 %v130_v31  ;;  %v1473_v30 = vperm.slane %v378_v17, 1  ;;  %v1475_v31 = vperm.slane %v400_v18, 1 }
  0x3c   :  { %177 = vmatmul.f32.vlgmr.msra.gmra.mxu0 %v125_v32  ;;  %206 = vmatmul.f32.vlgmr.msra.gmra.mxu1 %v125_v32 }
  0x3d   :  { %2161 = vst [vmem:[#allocation22_spill] sm:$0xff] %v1473_v30 }
  0x3e   :  { %2162 = vst [vmem:[#allocation23_spill] sm:$0xff] %v1475_v31 }
  0x44   :  { %180 = vmatmul.f32.gmra.mxu0 %v126_v33  ;;  %209 = vmatmul.f32.gmra.mxu1 %v126_v33 }
  0x4c   :  { %212 = vmatmul.f32.gmra.mxu1 %v127_v34  ;;  %183 = vmatmul.f32.gmra.mxu0 %v127_v34 }
  0x54   :  { %215 = vmatmul.f32.gmra.mxu1 %v128_v35  ;;  %186 = vmatmul.f32.gmra.mxu0 %v128_v35 }
  0xb9   :  { %v178_v42 = vpop.f32.mrf.mxu0  ;;  %v207_v43 = vpop.f32.mrf.mxu1 }
  0xba   :  { %v225_v44 = vmul.f32 %v1379_v38, %v178_v42  ;;  %v226_v45 = vmul.f32 %v222_v39, %v207_v43  ;;  %v399_v43 = vperm.slane %v1441_v13, 1 }
  0xbc   :  { %v239_v46 = vadd.f32 %v1381_v40, %v225_v44  ;;  %v240_v47 = vadd.f32 %v236_v41, %v226_v45 }
  0xbe   :  { %v1385_v48 = vmax.f32 %v239_v46, 0.0  ;;  %v1387_v49 = vmax.f32 %v240_v47, 0.0 }
  0xc0   :  { %622 = vrot.lane.b32.xlu0 %v1387_v49, %s1293_s3  ;;  %498 = vrot.lane.b32.xlu2 %v1385_v48, %s1285_s15  ;;  %v270_v50 = vrot.slane %v1385_v48, 7  ;;  %v271_v55 = vrot.slane %v1387_v49, 7  ;;  %v700_v16 = vrot.slane %v1387_v49, 1  ;;  %v697_v37 = vrot.slane %v1385_v48, 1 }
  0xc1   :  { %v210_v51 = vpop.f32.mrf.mxu1  ;;  %v181_v56 = vpop.f32.mrf.mxu0 }
  0xc2   :  { %v228_v52 = vmul.f32 %v222_v39, %v210_v51  ;;  %v1395_v53 = vsel %vm269_vm0, 0.0, %v270_v50  ;;  %v227_v57 = vmul.f32 %v1379_v38, %v181_v56  ;;  %v1408_v59 = vsel %vm269_vm0, 0.0, %v271_v55 }
  0xc3   :  { %421 = vrot.lane.b32.xlu1 %v1395_v53, %s1293_s3  ;;  %v1513_v51 = vperm.slane %v399_v43, 1  ;;  %v976_v43 = vld [vmem:[#allocation11 + $0xe8] sm:$0xff] }
  0xc4   :  { %v242_v54 = vadd.f32 %v236_v41, %v228_v52  ;;  %v241_v60 = vadd.f32 %v1381_v40, %v227_v57  ;;  %v1515_v52 = vld [vmem:[#allocation8 + $0x8] sm:$0x77] }
  0xc6   :  { %v1405_v58 = vmax.f32 %v242_v54, 0.0  ;;  %v1418_v0 = vmax.f32 %v241_v60, 0.0  ;;  %v1517_v54 = vld [vmem:[#allocation10 + $0x8] sm:$0x77] }
  0xc8   :  { %500 = vrot.lane.b32.xlu2 %v1387_v49, %s1285_s15  ;;  %298 = vrot.lane.b32.xlu0 %v1395_v53, %s1285_s15  ;;  %v274_v61 = vrot.slane %v1405_v58, 7  ;;  %v272_v3 = vrot.slane %v1418_v0, 7  ;;  %v701_v15 = vrot.slane %v1405_v58, 1  ;;  %v698_v33 = vrot.slane %v1418_v0, 1 }
  0xc9   :  { %v213_v62 = vpop.f32.mrf.mxu1  ;;  %v184_v4 = vpop.f32.mrf.mxu0 }
  0xca   :  { %v230_v63 = vmul.f32 %v222_v39, %v213_v62  ;;  %v1421_v1 = vsel %vm269_vm0, %v271_v55, %v274_v61  ;;  %v229_v6 = vmul.f32 %v1379_v38, %v184_v4  ;;  %v1432_v8 = vsel %vm269_vm0, %v270_v50, %v272_v3 }
  0xcb   :  { %423 = vrot.lane.b32.xlu1 %v1408_v59, %s1293_s3  ;;  %v1459_v25 = vsel %vm696_vm1, %v700_v16, %v701_v15  ;;  %v1502_v44 = vsel %vm696_vm1, %v697_v37, %v698_v33  ;;  %v577_v61 = vperm.slane %v1515_v52, 5  ;;  %v599_v62 = vperm.slane %v1517_v54, 5  ;;  %v961_v37 = vld [vmem:[#allocation11 + $0x70] sm:$0xff] }
  0xcc   :  { %v244_v2 = vadd.f32 %v236_v41, %v230_v63  ;;  %v243_v9 = vadd.f32 %v1381_v40, %v229_v6  ;;  %v1538_v63 = vsel %vm696_vm1, %v701_v15, 0.0 }
  0xcd   :  { %v1544_v3 = vperm.slane %v599_v62, 1  ;;  %v598_v62 = vperm.slane %v1517_v54, 1 }
  0xce   :  { %v1437_v11 = vmax.f32 %v244_v2, 0.0  ;;  %v1480_v34 = vmax.f32 %v243_v9, 0.0  ;;  %v1542_v2 = vperm.slane %v577_v61, 1  ;;  %v1564_v9 = vld [vmem:[#allocation8 + $0x10] sm:$0x77] }
  0xcf   :  { %2173 = vst [vmem:[#allocation34_spill] sm:$0xff] %v1544_v3  ;;  %v803_v15 = vperm.slane %v1564_v9, 1  ;;  %v975_v61 = vld [vmem:[#allocation11 + $0xe0] sm:$0xff] }
  0xd0   :  { %620 = vrot.lane.b32.xlu2 %v1385_v48, %s1293_s3  ;;  %300 = vrot.lane.b32.xlu0 %v1408_v59, %s1285_s15  ;;  %2158 = vst [vmem:[#allocation19_spill] sm:$0xff] %v1437_v11  ;;  %v277_v20 = vrot.slane %v1437_v11, 7  ;;  %v706_v22 = vrot.slane %v1437_v11, 1  ;;  %v703_v42 = vrot.slane %v1480_v34, 1 }
  0xd1   :  { %v216_v5 = vpop.f32.mrf.mxu1  ;;  %v187_v19 = vpop.f32.mrf.mxu0  ;;  %2164 = vst [vmem:[#allocation25_spill] sm:$0xff] %v1480_v34  ;;  %v1576_v17 = vperm.slane %v803_v15, 1  ;;  %v531_v15 = vperm.slane %v1515_v52, 0 }
  0xd2   :  { %v232_v7 = vmul.f32 %v222_v39, %v216_v5  ;;  %v231_v24 = vmul.f32 %v1379_v38, %v187_v19  ;;  %v1462_v26 = vsel %vm269_vm0, 0.0, %v277_v20  ;;  %v276_v38 = vrot.slane %v1480_v34, 7  ;;  %2172 = vst [vmem:[#allocation33_spill] sm:$0xff] %v1542_v2 }
  0xd3   :  { %304 = vrot.lane.b32.xlu1 %v1421_v1, %s1285_s15  ;;  %2159 = vst [vmem:[#allocation20_spill] sm:$0xff] %v1462_v26  ;;  %v377_v39 = vperm.slane %v1439_v12, 1  ;;  %v1550_v5 = vsel %vm696_vm1, %v698_v33, 0.0 }
  0xd4   :  { %v246_v10 = vadd.f32 %v236_v41, %v232_v7  ;;  %v245_v29 = vadd.f32 %v1381_v40, %v231_v24  ;;  %v292_v45 = vsel %vm269_vm0, 0.0, %v276_v38  ;;  %2175 = vst [vmem:[#allocation36_spill] sm:$0xff] %v1550_v5  ;;  %v962_v24 = vld [vmem:[#allocation11 + $0x78] sm:$0xff] }
  0xd5   :  { %v1511_v50 = vperm.slane %v377_v39, 1  ;;  %v1523_v56 = vmul.f32 %v1513_v51, %v292_v45  ;;  %2178 = vst [vmem:[#allocation39_spill] sm:$0xff] %v1576_v17  ;;  %979 = vmatpush.msra.mxu2 %v962_v24  ;;  %v332_v39 = vperm.slane %v1439_v12, 0  ;;  %v476_v24 = vperm.slane %v1441_v13, 2 }
  0xd6   :  { %v1443_v14 = vmax.f32 %v246_v10, 0.0  ;;  %v1477_v32 = vmax.f32 %v245_v29, 0.0  ;;  %v1566_v10 = vld [vmem:[#allocation10 + $0x10] sm:$0x77] }
  0xd7   :  { %v1520_v55 = vmul.f32 %v1511_v50, %v292_v45  ;;  %2169 = vst [vmem:[#allocation30_spill] sm:$0xff] %v1523_v56  ;;  %v825_v16 = vperm.slane %v1566_v10, 1  ;;  %v978_v29 = vld [vmem:[#allocation11 + $0xf8] sm:$0xff]  ;;  %980 = vmatpush.msra.mxu2 %v961_v37  ;;  %v971_v56 = vld [vmem:[#allocation11 + $0xc0] sm:$0xff] }
  0xd8   :  { %504 = vrot.lane.b32.xlu0 %v1405_v58, %s1285_s15  ;;  %502 = vrot.lane.b32.xlu2 %v1418_v0, %s1285_s15  ;;  %v280_v21 = vrot.slane %v1443_v14, 7  ;;  %v707_v23 = vrot.slane %v1443_v14, 1  ;;  %2163 = vst [vmem:[#allocation24_spill] sm:$0xff] %v1477_v32  ;;  %v278_v40 = vrot.slane %v1477_v32, 7  ;;  %v704_v41 = vrot.slane %v1477_v32, 1 }
  0xd9   :  { %2168 = vst [vmem:[#allocation29_spill] sm:$0xff] %v1520_v55  ;;  %v1554_v6 = vmul.f32 %v1542_v2, %v1443_v14  ;;  %v1558_v7 = vmul.f32 %v1544_v3, %v1443_v14  ;;  %v1578_v18 = vperm.slane %v825_v16, 1  ;;  %1008 = vmatpush.msra.mxu3 %v978_v29  ;;  %v454_v16 = vperm.slane %v1439_v12, 2 }
  0xda   :  { %v1465_v27 = vsel %vm269_vm0, %v277_v20, %v280_v21  ;;  %v1468_v28 = vsel %vm696_vm1, %v706_v22, %v707_v23  ;;  %v279_v46 = vsel %vm269_vm0, %v276_v38, %v278_v40  ;;  %v1509_v47 = vsel %vm696_vm1, %v703_v42, %v704_v41  ;;  %v977_v38 = vld [vmem:[#allocation11 + $0xf0] sm:$0xff]  ;;  %v960_v42 = vld [vmem:[#allocation11 + $0x68] sm:$0xff] }
  0xdb   :  { %425 = vrot.lane.b32.xlu1 %v1432_v8, %s1293_s3  ;;  %2160 = vst [vmem:[#allocation21_spill] sm:$0xff] %v1468_v28  ;;  %v1484_v35 = vmul.f32 %v1473_v30, %v1465_v27  ;;  %v1488_v36 = vmul.f32 %v1475_v31, %v1465_v27  ;;  %v1526_v57 = vmul.f32 %v1511_v50, %v279_v46  ;;  %v1547_v4 = vsel %vm696_vm1, %v707_v23, 0.0 }
  0xdc   :  { %2167 = vst [vmem:[#allocation28_spill] sm:$0xff] %v1509_v47  ;;  %v1529_v60 = vmul.f32 %v1513_v51, %v279_v46  ;;  %v1581_v19 = vsel %vm696_vm1, %v704_v41, 0.0  ;;  %v355_v40 = vperm.slane %v1441_v13, 0  ;;  %1009 = vmatpush.msra.mxu3 %v977_v38  ;;  %981 = vmatpush.msra.mxu2 %v960_v42  ;;  %v1646_v29 = vperm.slane %v332_v39, 0  ;;  %v958_v38 = vld [vmem:[#allocation11 + $0x58] sm:$0xff] }
  0xdd   :  { %2165 = vst [vmem:[#allocation26_spill] sm:$0xff] %v1484_v35  ;;  %v1587_v20 = vmul.f32 %v1576_v17, %v1581_v19  ;;  %v1591_v21 = vmul.f32 %v1578_v18, %v1581_v19  ;;  %v554_v42 = vperm.slane %v1517_v54, 0  ;;  %v333_v35 = vperm.slane %v1439_v12, 4 }
  0xde   :  { %2166 = vst [vmem:[#allocation27_spill] sm:$0xff] %v1488_v36  ;;  %1010 = vmatpush.msra.mxu3 %v976_v43  ;;  %v1648_v37 = vperm.slane %v355_v40, 0  ;;  %v1659_v40 = vperm.slane %v598_v62, 1  ;;  %v1661_v36 = vperm.slane %v531_v15, 0  ;;  %v356_v62 = vperm.slane %v1441_v13, 4 }
  0xdf   :  { %2170 = vst [vmem:[#allocation31_spill] sm:$0xff] %v1526_v57  ;;  %v1674_v15 = vperm.slane %v554_v42, 0 }
  0xe0   :  { %626 = vrot.lane.b32.xlu0 %v1405_v58, %s1293_s3  ;;  %624 = vrot.lane.b32.xlu2 %v1418_v0, %s1293_s3  ;;  %2171 = vst [vmem:[#allocation32_spill] sm:$0xff] %v1529_v60 }
  0xe1   :  { %2174 = vst [vmem:[#allocation35_spill] sm:$0xff] %v1547_v4  ;;  %1011 = vmatpush.msra.mxu3 %v975_v61  ;;  %v1668_v61 = vperm.slane %v476_v24, 2  ;;  %v957_v24 = vld [vmem:[#allocation11 + $0x50] sm:$0xff] }
  0xe2   :  { %2176 = vst [vmem:[#allocation37_spill] sm:$0xff] %v1554_v6  ;;  %v405_v6 = vmul.f32 %v1513_v51, %v1395_v53 }
  0xe3   :  { %727 = vrot.lane.b32.xlu1 %v1459_v25, %s1285_s15  ;;  %2177 = vst [vmem:[#allocation38_spill] sm:$0xff] %v1558_v7  ;;  %v383_v7 = vmul.f32 %v1511_v50, %v1395_v53 }
  0xe4   :  { %2179 = vst [vmem:[#allocation40_spill] sm:$0xff] %v1578_v18 }
  0xe5   :  { %2180 = vst [vmem:[#allocation41_spill] sm:$0xff] %v1587_v20 }
  0xe6   :  { %2181 = vst [vmem:[#allocation42_spill] sm:$0xff] %v1591_v21  ;;  %v974_v21 = vld [vmem:[#allocation11 + $0xd8] sm:$0xff] }
  0xe7   :  { %2182 = vst [vmem:[#allocation43_spill] sm:$0xff] %v1646_v29  ;;  %1012 = vmatpush.msra.mxu3 %v974_v21 }
  0xe8   :  { %427 = vrot.lane.b32.xlu2 %v1421_v1, %s1293_s3  ;;  %302 = vrot.lane.b32.xlu0 %v1432_v8, %s1285_s15  ;;  %2183 = vst [vmem:[#allocation44_spill] sm:$0xff] %v1648_v37 }
  0xe9   :  { %2186 = vst [vmem:[#allocation47_spill] sm:$0xff] %v1659_v40 }
  0xea   :  { %2187 = vst [vmem:[#allocation48_spill] sm:$0xff] %v1661_v36 }
  0xeb   :  { %847 = vrot.lane.b32.xlu1 %v1502_v44, %s1293_s3  ;;  %2189 = vst [vmem:[#allocation50_spill] sm:$0xff] %v1668_v61 }
  0xec   :  { %2190 = vst [vmem:[#allocation51_spill] sm:$0xff] %v1674_v15 }
  0xf0   :  { %849 = vrot.lane.b32.xlu2 %v1459_v25, %s1293_s3  ;;  %725 = vrot.lane.b32.xlu0 %v1502_v44, %s1285_s15 }
  0xf3   :  { %731 = vrot.lane.b32.xlu1 %v1538_v63, %s1285_s15 }
  0xf8   :  { %853 = vrot.lane.b32.xlu2 %v1538_v63, %s1293_s3  ;;  %729 = vrot.lane.b32.xlu0 %v1550_v5, %s1285_s15 }
  0xfb   :  { %851 = vrot.lane.b32.xlu1 %v1550_v5, %s1293_s3 }
 0x100   :  { %508 = vrot.lane.b32.xlu0 %v1437_v11, %s1285_s15  ;;  %506 = vrot.lane.b32.xlu2 %v1480_v34, %s1285_s15 }
 0x103   :  { %308 = vrot.lane.b32.xlu1 %v1462_v26, %s1285_s15 }
 0x108   :  { %630 = vrot.lane.b32.xlu0 %v1437_v11, %s1293_s3  ;;  %628 = vrot.lane.b32.xlu2 %v1480_v34, %s1293_s3  ;;  %v972_v11 = vld [vmem:[#allocation11 + $0xc8] sm:$0xff]  ;;  %v604_v34 = vmul.f32 %v1659_v40, %v1385_v48 }
 0x10b   :  { %429 = vrot.lane.b32.xlu1 %v292_v45, %s1293_s3 }
 0x110   :  { %431 = vrot.lane.b32.xlu2 %v1462_v26, %s1293_s3  ;;  %306 = vrot.lane.b32.xlu0 %v292_v45, %s1285_s15  ;;  %v576_v45 = vperm.slane %v1515_v52, 1 }
 0x112   :  { %v1651_v20 = vperm.slane %v576_v45, 1  ;;  %v1666_v45 = vperm.slane %v454_v16, 2 }
 0x113   :  { %634 = vrot.lane.b32.xlu1 %v1443_v14, %s1293_s3 }
 0x114   :  { %2184 = vst [vmem:[#allocation45_spill] sm:$0xff] %v1651_v20 }
 0x115   :  { %2188 = vst [vmem:[#allocation49_spill] sm:$0xff] %v1666_v45 }
 0x118   :  { %512 = vrot.lane.b32.xlu0 %v1443_v14, %s1285_s15  ;;  %510 = vrot.lane.b32.xlu2 %v1477_v32, %s1285_s15 }
 0x11a   :  { %v1607_v22 = vpop.permute.xlu2 %498 }
 0x11b   :  { %312 = vrot.lane.b32.xlu1 %v1465_v27, %s1285_s15  ;;  %v526_v57 = vsel %vm314_vm2, 0.0, %v1607_v22 }
 0x120   :  { %632 = vrot.lane.b32.xlu0 %v1477_v32, %s1293_s3  ;;  %435 = vrot.lane.b32.xlu2 %v1465_v27, %s1293_s3 }
 0x122   :  { %v1615_v23 = vpop.permute.xlu2 %500 }
 0x123   :  { %433 = vrot.lane.b32.xlu1 %v279_v46, %s1293_s3 }
 0x128   :  { %857 = vrot.lane.b32.xlu2 %v1468_v28, %s1293_s3  ;;  %310 = vrot.lane.b32.xlu0 %v279_v46, %s1285_s15  ;;  %v959_v46 = vld [vmem:[#allocation11 + $0x60] sm:$0xff] }
 0x129   :  { %982 = vmatpush.msra.mxu2 %v959_v46 }
 0x12a   :  { %v1621_v14 = vpop.permute.xlu2 %620 }
 0x12b   :  { %735 = vrot.lane.b32.xlu1 %v1468_v28, %s1285_s15  ;;  %983 = vmatpush.msra.mxu2 %v958_v38  ;;  %v973_v38 = vld [vmem:[#allocation11 + $0xd0] sm:$0xff]  ;;  %v956_v28 = vld [vmem:[#allocation11 + $0x48] sm:$0xff] }
 0x12c   :  { %1013 = vmatpush.msra.mxu3 %v973_v38  ;;  %v955_v38 = vld [vmem:[#allocation11 + $0x40] sm:$0xff] }
 0x12d   :  { %984 = vmatpush.msra.mxu2 %v957_v24 }
 0x12e   :  { %1014 = vmatpush.msra.mxu3 %v972_v11 }
 0x12f   :  { %985 = vmatpush.msra.mxu2 %v956_v28 }
 0x130   :  { %737 = vrot.lane.b32.xlu2 %v1581_v19, %s1285_s15  ;;  %733 = vrot.lane.b32.xlu0 %v1509_v47, %s1285_s15 }
 0x131   :  { %986 = vmatpush.msra.mxu2 %v955_v38  ;;  %1015 = vmatpush.msra.mxu3 %v971_v56  ;;  %v514_v56 = vsel %vm314_vm2, %v1607_v22, %v1615_v23  ;;  %v804_v22 = vperm.slane %v1564_v9, 5  ;;  %v826_v23 = vperm.slane %v1566_v10, 5 }
 0x132   :  { %v1629_v27 = vpop.permute.xlu0 %622  ;;  %v1631_v33 = vpop.permute.xlu2 %502 }
 0x133   :  { %855 = vrot.lane.b32.xlu1 %v1509_v47, %s1293_s3 }
 0x135   :  { %v422_v41 = vpop.permute.xlu1 %421 }
 0x138   :  { %861 = vrot.lane.b32.xlu2 %v1547_v4, %s1293_s3  ;;  %739 = vrot.lane.b32.xlu0 %v1547_v4, %s1285_s15 }
 0x13a   :  { %v299_v43 = vpop.permute.xlu0 %298  ;;  %v1657_v39 = vpop.permute.xlu2 %624 }
 0x13b   :  { %2185 = vst [vmem:[#allocation46_spill] sm:$0xff] %v1657_v39  ;;  %v327_v46 = vsel %vm314_vm2, 0.0, %v299_v43  ;;  %859 = vrot.lane.b32.xlu1 %v1581_v19, %s1293_s3  ;;  %v455_v19 = vperm.slane %v1439_v12, 6  ;;  %v582_v12 = vmul.f32 %v1651_v20, %v1385_v48 }
 0x13c   :  { %v338_v60 = vmul.f32 %v1646_v29, %v327_v46  ;;  %v361_v53 = vmul.f32 %v1648_v37, %v327_v46  ;;  %v477_v46 = vperm.slane %v1441_v13, 6  ;;  %v555_v13 = vperm.slane %v1517_v54, 4 }
 0x13d   :  { %v424_v16 = vpop.permute.xlu1 %423  ;;  %v1695_v55 = vperm.slane %v455_v19, 2 }
 0x13e   :  { %v391_v32 = vadd.f32 %v383_v7, %v338_v60  ;;  %v413_v4 = vadd.f32 %v405_v6, %v361_v53  ;;  %v438_v47 = vsel %vm437_vm3, %v422_v41, %v424_v16  ;;  %v532_v60 = vperm.slane %v1515_v52, 4 }
 0x13f   :  { %v460_v21 = vmul.f32 %v1666_v45, %v438_v47  ;;  %v482_v42 = vmul.f32 %v1668_v61, %v438_v47  ;;  %v1689_v6 = vperm.slane %v333_v35, 0  ;;  %v1691_v7 = vperm.slane %v356_v62, 0  ;;  %2193 = vst [vmem:[#allocation54_spill] sm:$0xff] %v1695_v55 }
 0x140   :  { %v537_v47 = vmul.f32 %v1661_v36, %v526_v57  ;;  %v560_v41 = vmul.f32 %v1674_v15, %v526_v57  ;;  %v1697_v48 = vperm.slane %v477_v46, 2  ;;  %v384_v35 = vmul.f32 %v1473_v30, %v1408_v59  ;;  %v954_v57 = vld [vmem:[#allocation11 + $0x38] sm:$0xff] }
 0x141   :  { %2191 = vst [vmem:[#allocation52_spill] sm:$0xff] %v1689_v6  ;;  %v468_v53 = vadd.f32 %v460_v21, %v391_v32  ;;  %v490_v24 = vadd.f32 %v482_v42, %v413_v4  ;;  %v406_v62 = vmul.f32 %v1475_v31, %v1408_v59  ;;  %v970_v32 = vld [vmem:[#allocation11 + $0xb8] sm:$0xff]  ;;  %v450_v4 = vsel %vm437_vm3, %v424_v16, 0.0  ;;  %987 = vmatpush.msra.mxu2 %v954_v57  ;;  %v968_v57 = vld [vmem:[#allocation11 + $0xa8] sm:$0xff] }
 0x142   :  { %2192 = vst [vmem:[#allocation53_spill] sm:$0xff] %v1691_v7  ;;  %v301_v28 = vpop.permute.xlu0 %300  ;;  %v1703_v11 = vpop.permute.xlu2 %427  ;;  %v1707_v42 = vperm.slane %v532_v60, 0  ;;  %v1709_v26 = vperm.slane %v555_v13, 0  ;;  %1016 = vmatpush.msra.mxu3 %v970_v32  ;;  %v969_v60 = vld [vmem:[#allocation11 + $0xb0] sm:$0xff]  ;;  %v461_v13 = vmul.f32 %v1695_v55, %v450_v4 }
 0x143   :  { %2194 = vst [vmem:[#allocation55_spill] sm:$0xff] %v1697_v48  ;;  %v545_v21 = vadd.f32 %v537_v47, %v468_v53  ;;  %v568_v19 = vadd.f32 %v560_v41, %v490_v24  ;;  %v315_v46 = vsel %vm314_vm2, %v299_v43, %v301_v28  ;;  %v953_v43 = vld [vmem:[#allocation11 + $0x30] sm:$0xff]  ;;  %v483_v41 = vmul.f32 %v1697_v48, %v450_v4  ;;  %v952_v28 = vld [vmem:[#allocation11 + $0x28] sm:$0xff] }
 0x144   :  { %v339_v39 = vmul.f32 %v1689_v6, %v315_v46  ;;  %v362_v59 = vmul.f32 %v1691_v7, %v315_v46  ;;  %988 = vmatpush.msra.mxu2 %v953_v43  ;;  %1017 = vmatpush.msra.mxu3 %v969_v60  ;;  %v561_v32 = vmul.f32 %v1709_v26, %v514_v56  ;;  %v967_v46 = vld [vmem:[#allocation11 + $0xa0] sm:$0xff]  ;;  %v966_v43 = vld [vmem:[#allocation11 + $0x98] sm:$0xff] }
 0x145   :  { %v1716_v38 = vpop.permute.xlu1 %304  ;;  %v1718_v16 = vadd.f32 %v582_v12, %v545_v21  ;;  %v1720_v47 = vadd.f32 %v604_v34, %v568_v19  ;;  %v951_v12 = vld [vmem:[#allocation11 + $0x20] sm:$0xff]  ;;  %v538_v34 = vmul.f32 %v1707_v42, %v514_v56  ;;  %v583_v60 = vmul.f32 %v1542_v2, %v1387_v49 }
 0x146   :  { %v392_v53 = vadd.f32 %v384_v35, %v339_v39  ;;  %v414_v24 = vadd.f32 %v406_v62, %v362_v59  ;;  %989 = vmatpush.msra.mxu2 %v952_v28  ;;  %1018 = vmatpush.msra.mxu3 %v968_v57  ;;  %v950_v39 = vld [vmem:[#allocation11 + $0x18] sm:$0xff]  ;;  %v605_v56 = vmul.f32 %v1544_v3, %v1387_v49  ;;  %v949_v57 = vld [vmem:[#allocation11 + $0x10] sm:$0xff] }
 0x147   :  { %v1749_v49 = vmul.f32 %v1651_v20, %v1418_v0 }
 0x148   :  { %v469_v21 = vadd.f32 %v461_v13, %v392_v53  ;;  %v491_v19 = vadd.f32 %v483_v41, %v414_v24  ;;  %990 = vmatpush.msra.mxu2 %v951_v12  ;;  %1019 = vmatpush.msra.mxu3 %v967_v46  ;;  %v1736_v13 = vperm.slane %v804_v22, 1  ;;  %v1738_v41 = vperm.slane %v826_v23, 1  ;;  %v965_v12 = vld [vmem:[#allocation11 + $0x90] sm:$0xff] }
 0x149   :  { %v1753_v22 = vmul.f32 %v1542_v2, %v1405_v58  ;;  %v1757_v23 = vmul.f32 %v1659_v40, %v1418_v0  ;;  %v674_v46 = vperm.slane %v1517_v54, 2  ;;  %v879_v2 = vperm.slane %v1564_v9, 2 }
 0x14a   :  { %v546_v35 = vadd.f32 %v538_v34, %v469_v21  ;;  %v569_v62 = vadd.f32 %v561_v32, %v491_v19  ;;  %v1728_v4 = vpop.permute.xlu0 %504  ;;  %v1730_v59 = vpop.permute.xlu2 %849  ;;  %2195 = vst [vmem:[#allocation56_spill] sm:$0xff] %v1736_v13  ;;  %991 = vmatpush.msra.mxu2 %v950_v39  ;;  %1020 = vmatpush.msra.mxu3 %v966_v43  ;;  %v652_v34 = vperm.slane %v1515_v52, 2  ;;  %v948_v32 = vld [vmem:[#allocation11 + $0x8] sm:$0xff]  ;;  %v653_v19 = vperm.slane %v1515_v52, 6  ;;  %v963_v43 = vld [vmem:[#allocation11 + $0x80] sm:$0xff] }
 0x14b   :  { %2196 = vst [vmem:[#allocation57_spill] sm:$0xff] %v1738_v41  ;;  %v964_v21 = vld [vmem:[#allocation11 + $0x88] sm:$0xff]  ;;  %v675_v39 = vperm.slane %v1517_v54, 6  ;;  %v1772_v0 = vmul.f32 %v1738_v41, %v1459_v25  ;;  %v1776_v52 = vmul.f32 %v1576_v17, %v1502_v44  ;;  %v1780_v54 = vmul.f32 %v1578_v18, %v1502_v44 }
 0x14c   :  { %v1742_v24 = vadd.f32 %v583_v60, %v546_v35  ;;  %v1744_v28 = vadd.f32 %v605_v56, %v569_v62  ;;  %992 = vmatpush.msra.mxu2 %v949_v57  ;;  %v1764_v35 = vmul.f32 %v1544_v3, %v1405_v58  ;;  %1021 = vmatpush.msra.mxu3 %v965_v12  ;;  %v947_v58 = vld [vmem:[#allocation11] sm:$0xff]  ;;  %v1798_v12 = vperm.slane %v652_v34, 2 }
 0x14d   :  { %v1740_v53 = vpop.permute.xlu1 %425  ;;  %v1768_v62 = vmul.f32 %v1736_v13, %v1459_v25  ;;  %v1784_v60 = vmul.f32 %v1736_v13, %v1538_v63  ;;  %v1788_v56 = vmul.f32 %v1738_v41, %v1538_v63  ;;  %v386_v25 = vmul.f32 %v1473_v30, %v1421_v1 }
 0x14e   :  { %993 = vmatpush.msra.mxu2 %v948_v32  ;;  %v408_v57 = vmul.f32 %v1475_v31, %v1421_v1  ;;  %1022 = vmatpush.msra.mxu3 %v964_v21  ;;  %v1796_v44 = vmul.f32 %v1576_v17, %v1550_v5  ;;  %v880_v32 = vperm.slane %v1564_v9, 6  ;;  %v902_v13 = vperm.slane %v1566_v10, 6 }
 0x14f   :  { %2197 = vst [vmem:[#allocation58_spill] sm:$0xff] %v1784_v60  ;;  %v1804_v41 = vperm.slane %v653_v19, 2  ;;  %v1806_v40 = vperm.slane %v674_v46, 2  ;;  %v1808_v1 = vperm.slane %v675_v39, 2  ;;  %v636_v21 = vsel %vm437_vm3, %v1621_v14, %v1629_v27 }
 0x150   :  { %2198 = vst [vmem:[#allocation59_spill] sm:$0xff] %v1788_v56  ;;  %994 = vmatpush.msra.mxu2 %v947_v58  ;;  %1023 = vmatpush.msra.mxu3 %v963_v43  ;;  %v648_v34 = vsel %vm437_vm3, %v1629_v27, 0.0  ;;  %v385_v17 = vmul.f32 %v1511_v50, %v1432_v8  ;;  %v901_v19 = vperm.slane %v1566_v10, 2  ;;  %v527_v46 = vsel %vm314_vm2, 0.0, %v1631_v33 }
 0x151   :  { %2199 = vst [vmem:[#allocation60_spill] sm:$0xff] %v1796_v44  ;;  %v407_v58 = vmul.f32 %v1513_v51, %v1432_v8  ;;  %v758_v14 = vperm.slane %v1564_v9, 0  ;;  %v759_v43 = vperm.slane %v1564_v9, 4  ;;  %v658_v27 = vmul.f32 %v1798_v12, %v636_v21 }
 0x152   :  { %v627_v3 = vpop.permute.xlu0 %626  ;;  %v1802_v63 = vpop.permute.xlu2 %853  ;;  %v451_v50 = vsel %vm437_vm3, %v1703_v11, 0.0  ;;  %v1830_v20 = vperm.slane %v880_v32, 2  ;;  %v1832_v31 = vperm.slane %v902_v13, 2  ;;  %v659_v30 = vmul.f32 %v1804_v41, %v648_v34 }
 0x153   :  { %2200 = vst [vmem:[#allocation61_spill] sm:$0xff] %v1802_v63  ;;  %v680_v56 = vmul.f32 %v1806_v40, %v636_v21  ;;  %v681_v60 = vmul.f32 %v1808_v1, %v648_v34  ;;  %v781_v8 = vperm.slane %v1566_v10, 0  ;;  %v539_v51 = vmul.f32 %v1661_v36, %v527_v46 }
 0x154   :  { %2201 = vst [vmem:[#allocation62_spill] sm:$0xff] %v1830_v20  ;;  %v562_v9 = vmul.f32 %v1674_v15, %v527_v46  ;;  %v1840_v44 = vperm.slane %v879_v2, 2  ;;  %v1842_v18 = vperm.slane %v901_v19, 2  ;;  %v463_v32 = vmul.f32 %v1695_v55, %v451_v50 }
 0x155   :  { %v1821_v39 = vpop.permute.xlu1 %727  ;;  %2202 = vst [vmem:[#allocation63_spill] sm:$0xff] %v1832_v31  ;;  %v485_v13 = vmul.f32 %v1697_v48, %v451_v50  ;;  %v1846_v5 = vperm.slane %v758_v14, 0  ;;  %v1848_v63 = vperm.slane %v759_v43, 0  ;;  %v439_v21 = vsel %vm437_vm3, %v1740_v53, %v1703_v11 }
 0x156   :  { %v666_v36 = vadd.f32 %v658_v27, %v1718_v16  ;;  %v688_v2 = vadd.f32 %v680_v56, %v1720_v47  ;;  %v782_v19 = vperm.slane %v1566_v10, 4  ;;  %v515_v46 = vsel %vm314_vm2, %v1631_v33, %v1728_v4  ;;  %v2203_v56 = vld [vmem:[#allocation46_spill] sm:$0xff] }
 0x157   :  { %v1862_v50 = vperm.slane %v781_v8, 0  ;;  %v875_v33 = vsel %vm437_vm3, %v1730_v59, 0.0  ;;  %v462_v4 = vmul.f32 %v1666_v45, %v439_v21  ;;  %v637_v27 = vsel %vm437_vm3, %v2203_v56, %v627_v3 }
 0x158   :  { %v660_v56 = vmul.f32 %v1798_v12, %v637_v27 }
 0x15a   :  { %v303_v34 = vpop.permute.xlu0 %302  ;;  %v1868_v10 = vpop.permute.xlu2 %506 }
 0x15b   :  { %v316_v14 = vsel %vm314_vm2, %v303_v34, %v1716_v38  ;;  %v328_v43 = vsel %vm314_vm2, 0.0, %v303_v34  ;;  %v484_v38 = vmul.f32 %v1668_v61, %v439_v21  ;;  %v886_v61 = vmul.f32 %v1830_v20, %v875_v33 }
 0x15c   :  { %v340_v11 = vmul.f32 %v1646_v29, %v328_v43  ;;  %v341_v53 = vmul.f32 %v1689_v6, %v316_v14  ;;  %v363_v16 = vmul.f32 %v1648_v37, %v328_v43  ;;  %v364_v47 = vmul.f32 %v1691_v7, %v316_v14 }
 0x15d   :  { %v848_v8 = vpop.permute.xlu1 %847  ;;  %v540_v43 = vmul.f32 %v1707_v42, %v515_v46  ;;  %v563_v14 = vmul.f32 %v1709_v26, %v515_v46  ;;  %v649_v7 = vsel %vm437_vm3, %v627_v3, 0.0  ;;  %v1879_v37 = vperm.slane %v782_v19, 0 }
 0x15e   :  { %v393_v34 = vadd.f32 %v385_v17, %v340_v11  ;;  %v394_v15 = vadd.f32 %v386_v25, %v341_v53  ;;  %v415_v48 = vadd.f32 %v407_v58, %v363_v16  ;;  %v416_v55 = vadd.f32 %v408_v57, %v364_v47 }
 0x15f   :  { %v667_v17 = vadd.f32 %v659_v30, %v1742_v24  ;;  %v689_v25 = vadd.f32 %v681_v60, %v1744_v28  ;;  %v661_v3 = vmul.f32 %v1804_v41, %v649_v7  ;;  %v682_v16 = vmul.f32 %v1806_v40, %v637_v27 }
 0x160   :  { %v470_v6 = vadd.f32 %v462_v4, %v393_v34  ;;  %v471_v45 = vadd.f32 %v463_v32, %v394_v15  ;;  %v492_v29 = vadd.f32 %v484_v38, %v415_v48  ;;  %v493_v21 = vadd.f32 %v485_v13, %v416_v55  ;;  %v2204_v38 = vld [vmem:[#allocation61_spill] sm:$0xff] }
 0x161   :  { %v863_v15 = vsel %vm437_vm3, %v848_v8, %v1730_v59  ;;  %v683_v47 = vmul.f32 %v1808_v1, %v649_v7  ;;  %v876_v8 = vsel %vm437_vm3, %v2204_v38, 0.0 }
 0x162   :  { %v547_v57 = vadd.f32 %v539_v51, %v470_v6  ;;  %v548_v58 = vadd.f32 %v540_v43, %v471_v45  ;;  %v570_v11 = vadd.f32 %v562_v9, %v492_v29  ;;  %v571_v46 = vadd.f32 %v563_v14, %v493_v21  ;;  %v726_v53 = vpop.permute.xlu0 %725  ;;  %v1899_v19 = vpop.permute.xlu2 %628 }
 0x163   :  { %v741_v55 = vsel %vm314_vm2, %v726_v53, %v1821_v39  ;;  %v753_v48 = vsel %vm314_vm2, 0.0, %v726_v53  ;;  %v885_v4 = vmul.f32 %v1840_v44, %v863_v15  ;;  %v888_v53 = vmul.f32 %v1830_v20, %v876_v8 }
 0x164   :  { %v764_v32 = vmul.f32 %v1846_v5, %v753_v48  ;;  %v765_v30 = vmul.f32 %v1848_v63, %v741_v55  ;;  %v787_v6 = vmul.f32 %v1862_v50, %v753_v48  ;;  %v788_v29 = vmul.f32 %v1879_v37, %v741_v55 }
 0x165   :  { %v732_v45 = vpop.permute.xlu1 %731  ;;  %v593_v24 = vadd.f32 %v1753_v22, %v548_v58  ;;  %v615_v28 = vadd.f32 %v1764_v35, %v571_v46  ;;  %v592_v59 = vadd.f32 %v1749_v49, %v547_v57  ;;  %v614_v60 = vadd.f32 %v1757_v23, %v570_v11  ;;  %v2205_v11 = vld [vmem:[#allocation36_spill] sm:$0xff] }
 0x166   :  { %v772_v39 = vadd.f32 %v764_v32, %v666_v36  ;;  %v773_v51 = vadd.f32 %v765_v30, %v667_v17  ;;  %v795_v9 = vadd.f32 %v787_v6, %v688_v2  ;;  %v796_v13 = vadd.f32 %v788_v29, %v689_v25  ;;  %v2206_v46 = vld [vmem:[#allocation40_spill] sm:$0xff] }
 0x167   :  { %v907_v22 = vmul.f32 %v1842_v18, %v863_v15  ;;  %v908_v2 = vmul.f32 %v1832_v31, %v875_v33  ;;  %v669_v27 = vadd.f32 %v661_v3, %v593_v24  ;;  %v691_v34 = vadd.f32 %v683_v47, %v615_v28  ;;  %v2208_v47 = vld [vmem:[#allocation58_spill] sm:$0xff] }
 0x168   :  { %v817_v35 = vadd.f32 %v1776_v52, %v772_v39  ;;  %v839_v49 = vadd.f32 %v1780_v54, %v795_v9  ;;  %v818_v23 = vadd.f32 %v1768_v62, %v773_v51  ;;  %v840_v36 = vadd.f32 %v1772_v0, %v796_v13  ;;  %v2207_v39 = vld [vmem:[#allocation60_spill] sm:$0xff] }
 0x169   :  { %v668_v43 = vadd.f32 %v660_v56, %v592_v59  ;;  %v690_v14 = vadd.f32 %v682_v16, %v614_v60  ;;  %v833_v56 = vmul.f32 %v2206_v46, %v2205_v11  ;;  %v910_v13 = vmul.f32 %v1832_v31, %v876_v8 }
 0x16a   :  { %v730_v7 = vpop.permute.xlu0 %729  ;;  %v893_v21 = vadd.f32 %v885_v4, %v817_v35  ;;  %v915_v17 = vadd.f32 %v907_v22, %v839_v49  ;;  %v894_v25 = vadd.f32 %v886_v61, %v818_v23  ;;  %v916_v62 = vadd.f32 %v908_v2, %v840_v36  ;;  %v432_v28 = vpop.permute.xlu2 %431  ;;  %v2209_v22 = vld [vmem:[#allocation59_spill] sm:$0xff] }
 0x16b   :  { %v742_v52 = vsel %vm314_vm2, %v730_v7, %v732_v45  ;;  %v754_v54 = vsel %vm314_vm2, 0.0, %v730_v7 }
 0x16c   :  { %v766_v0 = vmul.f32 %v1846_v5, %v754_v54  ;;  %v767_v33 = vmul.f32 %v1848_v63, %v742_v52  ;;  %v789_v57 = vmul.f32 %v1862_v50, %v754_v54  ;;  %v790_v58 = vmul.f32 %v1879_v37, %v742_v52 }
 0x16d   :  { %v852_v3 = vpop.permute.xlu1 %851  ;;  %v923_v15 = vmax.f32 %v893_v21, 0.0  ;;  %v931_v55 = vmax.f32 %v915_v17, 0.0  ;;  %v924_v45 = vmax.f32 %v894_v25, 0.0  ;;  %v932_v24 = vmax.f32 %v916_v62, 0.0 }
 0x16e   :  { %v774_v48 = vadd.f32 %v766_v0, %v668_v43  ;;  %v775_v32 = vadd.f32 %v767_v33, %v669_v27  ;;  %v797_v61 = vadd.f32 %v789_v57, %v690_v14  ;;  %v798_v30 = vadd.f32 %v790_v58, %v691_v34  ;;  %v2210_v0 = vld [vmem:[#allocation20_spill] sm:$0xff]  ;;  %v2211_v33 = vld [vmem:[#allocation22_spill] sm:$0xff]  ;;  %v2212_v58 = vld [vmem:[#allocation23_spill] sm:$0xff] }
 0x16f   :  { %v864_v6 = vsel %vm437_vm3, %v852_v3, %v2204_v38  ;;  %v939_v29 = vmul.f32 %v931_v55, %v923_v15  ;;  %v940_v16 = vmul.f32 %v932_v24, %v924_v45  ;;  %v452_v25 = vsel %vm437_vm3, %v432_v28, 0.0  ;;  %v2216_v24 = vld [vmem:[#allocation53_spill] sm:$0xff] }
 0x170   :  { %v887_v59 = vmul.f32 %v1840_v44, %v864_v6  ;;  %v909_v60 = vmul.f32 %v1842_v18, %v864_v6  ;;  %v819_v51 = vadd.f32 %v2207_v39, %v774_v48  ;;  %v841_v9 = vadd.f32 %v833_v56, %v797_v61  ;;  %v2218_v39 = vld [vmem:[#allocation55_spill] sm:$0xff] }
 0x171   :  { %995 = vmatmul.f32.vlgmr.msra.gmra.mxu2 %v939_v29  ;;  %v820_v4 = vadd.f32 %v2208_v47, %v775_v32  ;;  %v842_v35 = vadd.f32 %v2209_v22, %v798_v30  ;;  %1024 = vmatmul.f32.vlgmr.msra.gmra.mxu3 %v940_v16  ;;  %v388_v57 = vmul.f32 %v2211_v33, %v2210_v0  ;;  %v2213_v32 = vld [vmem:[#allocation43_spill] sm:$0xff]  ;;  %v2214_v30 = vld [vmem:[#allocation52_spill] sm:$0xff] }
 0x172   :  { %v509_v49 = vpop.permute.xlu0 %508  ;;  %v895_v23 = vadd.f32 %v887_v59, %v819_v51  ;;  %v917_v36 = vadd.f32 %v909_v60, %v841_v9  ;;  %v1929_v8 = vpop.permute.xlu2 %510  ;;  %v410_v11 = vmul.f32 %v2212_v58, %v2210_v0  ;;  %v2215_v29 = vld [vmem:[#allocation44_spill] sm:$0xff]  ;;  %v2217_v59 = vld [vmem:[#allocation54_spill] sm:$0xff]  ;;  %v487_v51 = vmul.f32 %v2218_v39, %v452_v25  ;;  %v2219_v9 = vld [vmem:[#allocation49_spill] sm:$0xff] }
 0x173   :  { %v896_v2 = vadd.f32 %v888_v53, %v820_v4  ;;  %v918_v38 = vadd.f32 %v910_v13, %v842_v35  ;;  %v528_v53 = vsel %vm314_vm2, 0.0, %v1868_v10  ;;  %v516_v3 = vsel %vm314_vm2, %v1868_v10, %v509_v49  ;;  %v2220_v13 = vld [vmem:[#allocation50_spill] sm:$0xff]  ;;  %v2221_v4 = vld [vmem:[#allocation29_spill] sm:$0xff] }
 0x174   :  { %v925_v34 = vmax.f32 %v895_v23, 0.0  ;;  %v933_v7 = vmax.f32 %v917_v36, 0.0  ;;  %v465_v60 = vmul.f32 %v2217_v59, %v452_v25  ;;  %v2222_v49 = vld [vmem:[#allocation30_spill] sm:$0xff]  ;;  %v2225_v58 = vld [vmem:[#allocation25_spill] sm:$0xff] }
 0x175   :  { %v309_v27 = vpop.permute.xlu1 %308  ;;  %v926_v43 = vmax.f32 %v896_v2, 0.0  ;;  %v934_v14 = vmax.f32 %v918_v38, 0.0  ;;  %v2223_v2 = vld [vmem:[#allocation48_spill] sm:$0xff] }
 0x176   :  { %v941_v21 = vmul.f32 %v933_v7, %v925_v34  ;;  %v541_v38 = vmul.f32 %v2223_v2, %v528_v53  ;;  %v542_v7 = vmul.f32 %v1707_v42, %v516_v3 }
 0x177   :  { %v942_v17 = vmul.f32 %v934_v14, %v926_v43  ;;  %v565_v43 = vmul.f32 %v1709_v26, %v516_v3  ;;  %v2230_v3 = vld [vmem:[#allocation34_spill] sm:$0xff] }
 0x179   :  { %998 = vmatmul.f32.gmra.mxu2 %v941_v21  ;;  %1027 = vmatmul.f32.gmra.mxu3 %v942_v17 }
 0x17a   :  { %v631_v52 = vpop.permute.xlu0 %630  ;;  %v1943_v48 = vpop.permute.xlu2 %435 }
 0x17d   :  { %v430_v54 = vpop.permute.xlu1 %429 }
 0x17e   :  { %v440_v62 = vsel %vm437_vm3, %v430_v54, %v432_v28 }
 0x17f   :  { %v464_v10 = vmul.f32 %v2219_v9, %v440_v62  ;;  %v486_v16 = vmul.f32 %v2220_v13, %v440_v62 }
 0x182   :  { %v307_v56 = vpop.permute.xlu0 %306 }
 0x183   :  { %v317_v15 = vsel %vm314_vm2, %v307_v56, %v309_v27  ;;  %v329_v55 = vsel %vm314_vm2, 0.0, %v307_v56  ;;  %v2224_v27 = vld [vmem:[#allocation51_spill] sm:$0xff]  ;;  %v2226_v56 = vld [vmem:[#allocation45_spill] sm:$0xff] }
 0x184   :  { %v342_v61 = vmul.f32 %v2213_v32, %v329_v55  ;;  %v343_v6 = vmul.f32 %v2214_v30, %v317_v15  ;;  %v365_v45 = vmul.f32 %v2215_v29, %v329_v55  ;;  %v366_v28 = vmul.f32 %v2216_v24, %v317_v15  ;;  %v2227_v15 = vld [vmem:[#allocation19_spill] sm:$0xff]  ;;  %v2228_v55 = vld [vmem:[#allocation33_spill] sm:$0xff] }
 0x185   :  { %v1953_v47 = vpop.permute.xlu1 %634  ;;  %v564_v34 = vmul.f32 %v2224_v27, %v528_v53  ;;  %v2229_v53 = vld [vmem:[#allocation47_spill] sm:$0xff] }
 0x186   :  { %v395_v22 = vadd.f32 %v2221_v4, %v342_v61  ;;  %v396_v35 = vadd.f32 %v388_v57, %v343_v6  ;;  %v417_v23 = vadd.f32 %v2222_v49, %v365_v45  ;;  %v418_v36 = vadd.f32 %v410_v11, %v366_v28  ;;  %v1969_v4 = vpop.permute.xlu2 %857  ;;  %v2232_v49 = vld [vmem:[#allocation56_spill] sm:$0xff] }
 0x187   :  { %v586_v11 = vmul.f32 %v2226_v56, %v2225_v58  ;;  %v587_v61 = vmul.f32 %v2228_v55, %v2227_v15  ;;  %v608_v6 = vmul.f32 %v2229_v53, %v2225_v58  ;;  %v609_v45 = vmul.f32 %v2230_v3, %v2227_v15 }
 0x188   :  { %v472_v14 = vadd.f32 %v464_v10, %v395_v22  ;;  %v473_v21 = vadd.f32 %v465_v60, %v396_v35  ;;  %v494_v17 = vadd.f32 %v486_v16, %v417_v23  ;;  %v495_v54 = vadd.f32 %v487_v51, %v418_v36  ;;  %v2231_v35 = vld [vmem:[#allocation21_spill] sm:$0xff] }
 0x189   :  { %v1973_v23 = vmul.f32 %v2232_v49, %v2231_v35  ;;  %v529_v36 = vsel %vm314_vm2, 0.0, %v1929_v8 }
 0x18a   :  { %v549_v25 = vadd.f32 %v541_v38, %v472_v14  ;;  %v550_v62 = vadd.f32 %v542_v7, %v473_v21  ;;  %v572_v0 = vadd.f32 %v564_v34, %v494_v17  ;;  %v573_v33 = vadd.f32 %v565_v43, %v495_v54  ;;  %v513_v57 = vpop.permute.xlu0 %512  ;;  %v2233_v43 = vld [vmem:[#allocation57_spill] sm:$0xff]  ;;  %v2234_v21 = vld [vmem:[#allocation28_spill] sm:$0xff]  ;;  %v2235_v17 = vld [vmem:[#allocation39_spill] sm:$0xff] }
 0x18b   :  { %v638_v38 = vsel %vm437_vm3, %v1899_v19, %v631_v52  ;;  %v650_v34 = vsel %vm437_vm3, %v631_v52, 0.0  ;;  %v1982_v14 = vmul.f32 %v2233_v43, %v2231_v35  ;;  %v1986_v54 = vmul.f32 %v2235_v17, %v2234_v21 }
 0x18c   :  { %v594_v60 = vadd.f32 %v586_v11, %v549_v25  ;;  %v595_v51 = vadd.f32 %v587_v61, %v550_v62  ;;  %v616_v10 = vadd.f32 %v608_v6, %v572_v0  ;;  %v617_v16 = vadd.f32 %v609_v45, %v573_v33  ;;  %v2236_v0 = vld [vmem:[#allocation35_spill] sm:$0xff]  ;;  %v2238_v33 = vld [vmem:[#allocation24_spill] sm:$0xff] }
 0x18d   :  { %v313_v28 = vpop.permute.xlu1 %312  ;;  %v1990_v25 = vmul.f32 %v2206_v46, %v2234_v21  ;;  %v453_v62 = vsel %vm437_vm3, %v1943_v48, 0.0  ;;  %v1996_v19 = vmul.f32 %v2232_v49, %v2236_v0  ;;  %v877_v52 = vsel %vm437_vm3, %v1969_v4, 0.0 }
 0x18e   :  { %v588_v58 = vmul.f32 %v2226_v56, %v2238_v33  ;;  %v610_v11 = vmul.f32 %v2229_v53, %v2238_v33  ;;  %v543_v15 = vmul.f32 %v2223_v2, %v529_v36  ;;  %v566_v46 = vmul.f32 %v2224_v27, %v529_v36  ;;  %v2008_v6 = vpop.permute.xlu2 %737 }
 0x18f   :  { %2237 = vst [vmem:[#allocation46_spill] sm:$0xff] %v1996_v19  ;;  %v662_v55 = vmul.f32 %v1798_v12, %v638_v38  ;;  %v663_v61 = vmul.f32 %v1804_v41, %v650_v34  ;;  %v684_v3 = vmul.f32 %v1806_v40, %v638_v38  ;;  %v685_v45 = vmul.f32 %v1808_v1, %v650_v34 }
 0x190   :  { %v467_v35 = vmul.f32 %v2217_v59, %v453_v62  ;;  %v489_v56 = vmul.f32 %v2218_v39, %v453_v62  ;;  %v2015_v53 = vmul.f32 %v1830_v20, %v877_v52  ;;  %v2018_v2 = vmul.f32 %v1832_v31, %v877_v52 }
 0x191   :  { %v651_v27 = vsel %vm437_vm3, %v1953_v47, 0.0  ;;  %v517_v38 = vsel %vm314_vm2, %v1929_v8, %v513_v57  ;;  %v756_v59 = vsel %vm314_vm2, 0.0, %v2008_v6 }
 0x192   :  { %v633_v22 = vpop.permute.xlu0 %632 }
 0x195   :  { %v434_v7 = vpop.permute.xlu1 %433 }
 0x196   :  { %v441_v49 = vsel %vm437_vm3, %v434_v7, %v1943_v48  ;;  %v665_v48 = vmul.f32 %v1804_v41, %v651_v27  ;;  %v687_v7 = vmul.f32 %v1808_v1, %v651_v27  ;;  %v770_v41 = vmul.f32 %v1846_v5, %v756_v59 }
 0x197   :  { %v466_v8 = vmul.f32 %v2219_v9, %v441_v49  ;;  %v488_v57 = vmul.f32 %v2220_v13, %v441_v49  ;;  %v639_v1 = vsel %vm437_vm3, %v633_v22, %v1953_v47 }
 0x19a   :  { %v311_v36 = vpop.permute.xlu0 %310 }
 0x19b   :  { %v318_v39 = vsel %vm314_vm2, %v311_v36, %v313_v28  ;;  %v330_v34 = vsel %vm314_vm2, 0.0, %v311_v36  ;;  %v2239_v28 = vld [vmem:[#allocation31_spill] sm:$0xff]  ;;  %v2240_v36 = vld [vmem:[#allocation26_spill] sm:$0xff] }
 0x19c   :  { %v344_v21 = vmul.f32 %v2213_v32, %v330_v34  ;;  %v345_v17 = vmul.f32 %v2214_v30, %v318_v39  ;;  %v367_v62 = vmul.f32 %v2215_v29, %v330_v34  ;;  %v368_v52 = vmul.f32 %v2216_v24, %v318_v39  ;;  %v2241_v32 = vld [vmem:[#allocation32_spill] sm:$0xff]  ;;  %v2242_v30 = vld [vmem:[#allocation27_spill] sm:$0xff] }
 0x19d   :  { %v736_v33 = vpop.permute.xlu1 %735  ;;  %v544_v29 = vmul.f32 %v1707_v42, %v517_v38  ;;  %v567_v24 = vmul.f32 %v1709_v26, %v517_v38  ;;  %v670_v39 = vadd.f32 %v662_v55, %v594_v60  ;;  %v671_v34 = vadd.f32 %v663_v61, %v595_v51 }
 0x19e   :  { %v397_v19 = vadd.f32 %v2239_v28, %v344_v21  ;;  %v398_v31 = vadd.f32 %v2240_v36, %v345_v17  ;;  %v419_v20 = vadd.f32 %v2241_v32, %v367_v62  ;;  %v420_v43 = vadd.f32 %v2242_v30, %v368_v52 }
 0x19f   :  { %v692_v21 = vadd.f32 %v684_v3, %v616_v10  ;;  %v693_v17 = vadd.f32 %v685_v45, %v617_v16  ;;  %v664_v26 = vmul.f32 %v1798_v12, %v639_v1  ;;  %v686_v38 = vmul.f32 %v1806_v40, %v639_v1  ;;  %v862_v10 = vpop.permute.xlu2 %861 }
 0x1a0   :  { %v474_v9 = vadd.f32 %v466_v8, %v397_v19  ;;  %v475_v13 = vadd.f32 %v467_v35, %v398_v31  ;;  %v496_v27 = vadd.f32 %v488_v57, %v419_v20  ;;  %v497_v49 = vadd.f32 %v489_v56, %v420_v43  ;;  %v2243_v19 = vld [vmem:[#allocation37_spill] sm:$0xff] }
 0x1a1   :  { %v793_v35 = vmul.f32 %v1862_v50, %v756_v59  ;;  %v878_v56 = vsel %vm437_vm3, %v862_v10, 0.0 }
 0x1a2   :  { %v551_v62 = vadd.f32 %v543_v15, %v474_v9  ;;  %v552_v28 = vadd.f32 %v544_v29, %v475_v13  ;;  %v574_v52 = vadd.f32 %v566_v46, %v496_v27  ;;  %v575_v36 = vadd.f32 %v567_v24, %v497_v49  ;;  %v734_v42 = vpop.permute.xlu0 %733  ;;  %v2244_v15 = vld [vmem:[#allocation38_spill] sm:$0xff] }
 0x1a3   :  { %v743_v32 = vsel %vm314_vm2, %v734_v42, %v736_v33  ;;  %v755_v47 = vsel %vm314_vm2, 0.0, %v734_v42 }
 0x1a4   :  { %v596_v31 = vadd.f32 %v588_v58, %v551_v62  ;;  %v618_v20 = vadd.f32 %v610_v11, %v574_v52  ;;  %v768_v60 = vmul.f32 %v1846_v5, %v755_v47  ;;  %v769_v51 = vmul.f32 %v1848_v63, %v743_v32  ;;  %v2247_v62 = vld [vmem:[#allocation57_spill] sm:$0xff] }
 0x1a5   :  { %v791_v16 = vmul.f32 %v1862_v50, %v755_v47  ;;  %v792_v22 = vmul.f32 %v1879_v37, %v743_v32  ;;  %v856_v43 = vpop.permute.xlu1 %855  ;;  %v597_v12 = vadd.f32 %v2243_v19, %v552_v28  ;;  %v619_v40 = vadd.f32 %v2244_v15, %v575_v36  ;;  %v2249_v32 = vld [vmem:[#allocation63_spill] sm:$0xff] }
 0x1a6   :  { %v776_v46 = vadd.f32 %v768_v60, %v670_v39  ;;  %v777_v55 = vadd.f32 %v769_v51, %v671_v34  ;;  %v865_v58 = vsel %vm437_vm3, %v856_v43, %v1969_v4  ;;  %v672_v11 = vadd.f32 %v664_v26, %v596_v31  ;;  %v2245_v34 = vld [vmem:[#allocation41_spill] sm:$0xff]  ;;  %v2248_v26 = vld [vmem:[#allocation62_spill] sm:$0xff] }
 0x1a7   :  { %v799_v61 = vadd.f32 %v791_v16, %v692_v21  ;;  %v800_v5 = vadd.f32 %v792_v22, %v693_v17  ;;  %v889_v3 = vmul.f32 %v1840_v44, %v865_v58  ;;  %v911_v45 = vmul.f32 %v1842_v18, %v865_v58  ;;  %v2246_v17 = vld [vmem:[#allocation42_spill] sm:$0xff]  ;;  %v1100_v58 = vld [vmem:[%s2103_s8] ss:$0 sm:$0xff] }
 0x1a8   :  { %v821_v8 = vadd.f32 %v1986_v54, %v776_v46  ;;  %v822_v57 = vadd.f32 %v1973_v23, %v777_v55  ;;  %v694_v4 = vadd.f32 %v686_v38, %v618_v20  ;;  %v778_v29 = vadd.f32 %v770_v41, %v672_v11  ;;  %v2250_v31 = vld [vmem:[#allocation46_spill] sm:$0xff] }
 0x1a9   :  { %v843_v33 = vadd.f32 %v1990_v25, %v799_v61  ;;  %v844_v30 = vadd.f32 %v1982_v14, %v800_v5  ;;  %v673_v24 = vadd.f32 %v665_v48, %v597_v12  ;;  %v695_v1 = vadd.f32 %v687_v7, %v619_v40  ;;  %v1099_v40 = vld [vmem:[%s2102_s7] ss:$0 sm:$0xff]  ;;  %s1294_s7 = smov [#allocation13]  }
 0x1aa   :  { %v740_v9 = vpop.permute.xlu0 %739  ;;  %v897_v13 = vadd.f32 %v889_v3, %v821_v8  ;;  %v898_v27 = vadd.f32 %v2015_v53, %v822_v57  ;;  %v801_v49 = vadd.f32 %v793_v35, %v694_v4  ;;  %v823_v21 = vadd.f32 %v2245_v34, %v778_v29  ;;  %v1101_v35 = vld [vmem:[#allocation2] sm:$0xff]  ;;  %v1102_v4 = vld [vmem:[#allocation2 + $0x8] sm:$0xff]  ;;  %s1069_s8 = sshll.u32 %s1294_s7, 4  ;;  %s1070_s8 = int_to_ptr.vmem [resolvable:$true] %s1069_s8 }
 0x1ab   :  { %v744_v50 = vsel %vm314_vm2, %v2008_v6, %v740_v9  ;;  %v919_v59 = vadd.f32 %v911_v45, %v843_v33  ;;  %v920_v54 = vadd.f32 %v2018_v2, %v844_v30  ;;  %v838_v6 = vmul.f32 %v2247_v62, %v2236_v0 }
 0x1ac   :  { %v771_v23 = vmul.f32 %v1848_v63, %v744_v50  ;;  %v794_v25 = vmul.f32 %v1879_v37, %v744_v50  ;;  %v927_v14 = vmax.f32 %v897_v13, 0.0  ;;  %v928_v39 = vmax.f32 %v898_v27, 0.0 }
 0x1ad   :  { %v860_v41 = vpop.permute.xlu1 %859  ;;  %v935_v48 = vmax.f32 %v919_v59, 0.0  ;;  %v936_v7 = vmax.f32 %v920_v54, 0.0  ;;  %v845_v53 = vadd.f32 %v2246_v17, %v801_v49  ;;  %v892_v38 = vmul.f32 %v2248_v26, %v878_v56  ;;  %v1103_v49 = vld [vmem:[#allocation2 + $0x10] sm:$0xff] }
 0x1ae   :  { %v779_v28 = vadd.f32 %v771_v23, %v673_v24  ;;  %v802_v52 = vadd.f32 %v794_v25, %v695_v1  ;;  %v866_v2 = vsel %vm437_vm3, %v860_v41, %v862_v10  ;;  %v914_v47 = vmul.f32 %v2249_v32, %v878_v56 }
 0x1af   :  { %v891_v63 = vmul.f32 %v1840_v44, %v866_v2  ;;  %v913_v37 = vmul.f32 %v1842_v18, %v866_v2  ;;  %v943_v36 = vmul.f32 %v935_v48, %v927_v14  ;;  %v944_v42 = vmul.f32 %v936_v7, %v928_v39  ;;  %v1104_v48 = vld [vmem:[#allocation2 + $0x18] sm:$0xff] }
 0x1b0   :  { %v824_v20 = vadd.f32 %v2250_v31, %v779_v28  ;;  %v846_v60 = vadd.f32 %v838_v6, %v802_v52 }
 0x1b1   :  { %1001 = vmatmul.f32.gmra.mxu2 %v943_v36  ;;  %1030 = vmatmul.f32.gmra.mxu3 %v944_v42  ;;  %v899_v0 = vadd.f32 %v891_v63, %v823_v21  ;;  %v921_v51 = vadd.f32 %v913_v37, %v845_v53 }
 0x1b2   :  { %v900_v16 = vadd.f32 %v892_v38, %v824_v20  ;;  %v922_v22 = vadd.f32 %v914_v47, %v846_v60 }
 0x1b3   :  { %v929_v10 = vmax.f32 %v899_v0, 0.0  ;;  %v937_v43 = vmax.f32 %v921_v51, 0.0 }
 0x1b4   :  { %v930_v44 = vmax.f32 %v900_v16, 0.0  ;;  %v938_v19 = vmax.f32 %v922_v22, 0.0 }
 0x1b5   :  { %v945_v18 = vmul.f32 %v937_v43, %v929_v10 }
 0x1b6   :  { %v946_v12 = vmul.f32 %v938_v19, %v930_v44 }
 0x1b9   :  { %1004 = vmatmul.f32.gmra.mxu2 %v945_v18  ;;  %1033 = vmatmul.f32.gmra.mxu3 %v946_v12 }
 0x1f4   :  { %v996_v15 = vpop.f32.mrf.mxu2  ;;  %v1025_v46 = vpop.f32.mrf.mxu3 }
 0x1f5   :  { %v1026_v55 = vadd.f32 %v1025_v46, %v996_v15 }
 0x1f7   :  { %v1041_v11 = vmul.f32 %v1099_v40, %v1026_v55 }
 0x1f9   :  { %v1049_v61 = vadd.f32 %v1100_v58, %v1041_v11 }
 0x1fb   :  { %v1053_v3 = vmax.f32 %v1049_v61, 0.0 }
 0x1fc   :  { %v999_v5 = vpop.f32.mrf.mxu2  ;;  %v1028_v45 = vpop.f32.mrf.mxu3 }
 0x1fd   :  { %v1057_v56 = vadd.f32 %v1101_v35, %v1053_v3  ;;  %v1029_v8 = vadd.f32 %v1028_v45, %v999_v5 }
 0x1ff   :  { %1061 = vst [vmem:[#allocation13] sm:$0xff] %v1057_v56  ;;  %v1042_v57 = vmul.f32 %v1099_v40, %v1029_v8 }
 0x201   :  { %v1050_v33 = vadd.f32 %v1100_v58, %v1042_v57 }
 0x203   :  { %v1054_v30 = vmax.f32 %v1050_v33, 0.0 }
 0x205   :  { %v1058_v29 = vadd.f32 %v1102_v4, %v1054_v30 }
 0x207   :  { %1062 = vst [vmem:[#allocation13 + $0x8] sm:$0xff] %v1058_v29 }
 0x234   :  { %v1002_v24 = vpop.f32.mrf.mxu2  ;;  %v1031_v1 = vpop.f32.mrf.mxu3 }
 0x235   :  { %v1032_v9 = vadd.f32 %v1031_v1, %v1002_v24 }
 0x237   :  { %v1043_v13 = vmul.f32 %v1099_v40, %v1032_v9 }
 0x239   :  { %v1051_v27 = vadd.f32 %v1100_v58, %v1043_v13 }
 0x23b   :  { %v1055_v50 = vmax.f32 %v1051_v27, 0.0 }
 0x23c   :  { %v1005_v59 = vpop.f32.mrf.mxu2  ;;  %v1034_v54 = vpop.f32.mrf.mxu3 }
 0x23d   :  { %v1059_v23 = vadd.f32 %v1103_v49, %v1055_v50  ;;  %v1035_v25 = vadd.f32 %v1034_v54, %v1005_v59 }
 0x23f   :  { %1063 = vst [vmem:[#allocation13 + $0x10] sm:$0xff] %v1059_v23  ;;  %v1044_v14 = vmul.f32 %v1099_v40, %v1035_v25 }
 0x241   :  { %v1052_v39 = vadd.f32 %v1100_v58, %v1044_v14 }
 0x243   :  { %v1056_v41 = vmax.f32 %v1052_v39, 0.0 }
 0x245   :  { %v1060_v7 = vadd.f32 %v1104_v48, %v1056_v41 }
 0x247   :  { %1064 = vst [vmem:[#allocation13 + $0x18] sm:$0xff] %v1060_v7 }
 0x248   :  { %1077 = dma.vmem_to_hbm [thread:$0]  %s1070_s8, 512, %s1072_s25, [#allocation4], %s1287_s23, %s1287_s23, %s1288_s24  }
 0x249   :  { %1281 = dma.done.wait [#allocation4], 512  }
 0x24a   :  { %1282 = vsyncadd [#allocation4], 4294966784 }
 0x24b   :  { %1082 = vsyncpa [#allocation3], 1 }
 0x24c   :  { %1083 = vsyncpa [#allocation6], 1 }
 0x24d   :  { %1084 = vsyncpa [#allocation9], 1 }
 0x24e   :  { %1085 = vsyncpa [#allocation12], 1 }
 0x24f   :  { %1086 = vsyncpa [#allocation4], 1 }

</bundles_post_ra>
